<compile_context>
chip_gen: v7x
topology: tpu7x:2x2x1
jax: 0.10.0
libtpu: 0.0.40
codegen_flags: <defaults>
</compile_context>

<pallas_src>
import functools
import math

import jax
import jax.numpy as jnp
from jax.experimental import pallas as pl
from jax.experimental.pallas import tpu as pltpu


def _round_up(x, m):
    return ((x + m - 1) // m) * m


def net_force_kernel(cd_ref, neigh_ref, w_ref, f_ref, ids_ref, *, lane_dense):
    """Accumulate scattered forces for one M tile.

    cd_ref   : (3, m_tile, D)              f32  coeffs_derivs tile
    neigh_ref: (1, m_tile) or (m_tile, 1)  i32  neighbor-atom ids for the tile
    w_ref    : (1, D)                      f32  weight1
    f_ref    : (3, a_pad)                  f32  resident accumulator (per partition)
    ids_ref  : (m_tile, a_pad)             i32  cached atom-id iota (scratch)
    """
    i = pl.program_id(1)

    @pl.when(i == 0)
    def _init():
        # Zero this partition's accumulator and (re)build the atom-id pattern.
        # Re-init at i == 0 keeps the scratch correct whether or not the
        # parallel axis is sharded across TensorCores.
        f_ref[...] = jnp.zeros_like(f_ref)
        ids_ref[...] = jax.lax.broadcasted_iota(jnp.int32, ids_ref.shape, 1)

    w = w_ref[...]                                              # (1, D)
    # f3[c, m] = -sum_d cd[c, m, d] * w[0, d]
    f3 = -jnp.sum(cd_ref[...] * w[None, :, :], axis=-1)         # (3, m_tile)

    if lane_dense:
        # neigh arrives lane-dense (1, m_tile); tiny XLU transpose to a column.
        neigh_col = jnp.transpose(neigh_ref[...])               # (m_tile, 1)
    else:
        neigh_col = neigh_ref[...]                              # (m_tile, 1)

    # One-hot scatter matrix: compare + convert only (iota is cached).  Padded
    # M rows carry the out-of-range sentinel (== a_pad) and zero cd, so they
    # contribute nothing.
    onehot = (neigh_col == ids_ref[...]).astype(jnp.float32)    # (m_tile, a_pad)
    f_ref[...] += jnp.dot(f3, onehot, preferred_element_type=jnp.float32)


def _choose_m_tile(m, num_desc, a_pad, budget_bytes=28 << 20):
    """Largest M tile (multiple of 128) whose working set fits the VMEM budget."""
    d_pad = _round_up(num_desc, 128)          # lane-padded layout of the D axis
    m_tile = min(4096, _round_up(m, 128))

    def tile_bytes(t):
        cd = 2 * 3 * t * d_pad * 4            # double-buffered cd tile
        prod = 3 * t * d_pad * 4              # cd * w temp before the D reduce
        neigh = 2 * t * 128 * 4               # worst case (column-layout fallback)
        onehot = t * a_pad * 4                # compare/convert temp
        ids = t * a_pad * 4                   # cached iota scratch
        return cd + prod + neigh + onehot + ids

    while m_tile > 128 and tile_bytes(m_tile) > budget_bytes:
        m_tile //= 2
    return max(128, m_tile)


def _force_pallas_call(coeffs_derivs, neigh_atom_index, weight1, num_atoms, *,
                       lane_dense):
    _, _, m, num_desc = coeffs_derivs.shape
    a_pad = _round_up(num_atoms, 128)         # lane-dense force output
    # TODO(synk): for very large num_atoms (a_pad >> 2048), chunk the atom axis
    # inside the kernel (or use a segment-sum formulation) instead of letting
    # the one-hot temp shrink m_tile.
    m_tile = _choose_m_tile(m, num_desc, a_pad)
    n_total = -(-m // m_tile)
    # Split M across the two v7x TensorCores when there is enough work; this is
    # a harmless serial split on single-core chips (v5e/v6e).
    num_parts = 2 if n_total >= 2 else 1
    m_pad = _round_up(m, m_tile * num_parts)
    n_tiles = m_pad // (m_tile * num_parts)

    cd3 = coeffs_derivs.reshape(3, m, num_desc).astype(jnp.float32)
    cd3 = jnp.pad(cd3, ((0, 0), (0, m_pad - m), (0, 0)))            # pad rows zero
    neigh = jnp.asarray(neigh_atom_index, dtype=jnp.int32).reshape(m)
    neigh = jnp.pad(neigh, (0, m_pad - m), constant_values=a_pad)   # out-of-range
    w = weight1.reshape(1, num_desc).astype(jnp.float32)

    if lane_dense:
        neigh_arr = neigh.reshape(1, m_pad)
        neigh_spec = pl.BlockSpec((1, m_tile), lambda p, i: (0, p * n_tiles + i))
    else:
        neigh_arr = neigh.reshape(m_pad, 1)
        neigh_spec = pl.BlockSpec((m_tile, 1), lambda p, i: (p * n_tiles + i, 0))

    kernel = functools.partial(net_force_kernel, lane_dense=lane_dense)

    partial_f = pl.pallas_call(
        kernel,
        out_shape=jax.ShapeDtypeStruct((3, num_parts * a_pad), jnp.float32),
        grid_spec=pltpu.PrefetchScalarGridSpec(
            num_scalar_prefetch=0,
            grid=(num_parts, n_tiles),
            in_specs=[
                pl.BlockSpec((3, m_tile, num_desc),
                             lambda p, i: (0, p * n_tiles + i, 0)),   # cd tile
                neigh_spec,                                           # neigh tile
                pl.BlockSpec((1, num_desc), lambda p, i: (0, 0)),     # weight1
            ],
            out_specs=pl.BlockSpec((3, a_pad), lambda p, i: (0, p)),  # per-part acc
            scratch_shapes=[pltpu.VMEM((m_tile, a_pad), jnp.int32)],  # cached iota
        ),
        compiler_params=pltpu.CompilerParams(
            dimension_semantics=("parallel", "arbitrary"),
            vmem_limit_bytes=44 * 1024 * 1024,
        ),
    )(cd3, neigh_arr, w)

    forces = partial_f.reshape(3, num_parts, a_pad).sum(axis=1)      # (3, a_pad)
    return forces[:, :num_atoms].reshape(1, 3, num_atoms)


def net_forward(coeffs, coeffs_derivs, central_atom_index, neigh_atom_index,
                weight1, bias1):
    del central_atom_index  # unused by the PyTorch forward as well
    num_atoms = coeffs.shape[1]

    # Scalar energy stays in plain JAX: one tiny reduction XLA overlaps with the
    # pallas_call; keeps coeffs/bias out of the kernel entirely.
    e_pa = (jnp.sum(coeffs.astype(jnp.float32) * weight1.astype(jnp.float32))
            / num_atoms + bias1.astype(jnp.float32)).reshape(1)

    try:
        out_f = _force_pallas_call(coeffs_derivs, neigh_atom_index, weight1,
                                   num_atoms, lane_dense=True)
        jax.block_until_ready(out_f)
    except Exception:
        # Fallback: previously-verified column-layout neigh blocks (slower DMA)
        # for Mosaic versions that reject the (1, m_tile) -> (m_tile, 1) relayout.
        out_f = _force_pallas_call(coeffs_derivs, neigh_atom_index, weight1,
                                   num_atoms, lane_dense=False)

    return e_pa, out_f


def net_forward_ref(coeffs, coeffs_derivs, neigh_atom_index, weight1, bias1):
    """Pure-JAX reference mirroring the PyTorch forward."""
    num_atoms = coeffs.shape[1]
    e_pa = jnp.sum(coeffs * weight1) / num_atoms + bias1          # (1,)
    f = -jnp.sum(coeffs_derivs * weight1, axis=3)                 # (1, 3, M)
    onehot = (neigh_atom_index[:, None] ==
              jnp.arange(num_atoms)[None, :]).astype(jnp.float32)  # (M, A)
    out_f = jnp.einsum('bcm,ma->bca', f, onehot)                  # (1, 3, A)
    return e_pa, out_f


if __name__ == "__main__":
    # Small deterministic problem sizes.
    num_descriptors = 32
    num_atoms = 8
    num_pairs = 16  # M: neighbor-pair entries

    key = jax.random.PRNGKey(0)
    k_w, k_c, k_cd, k_ci, k_ni = jax.random.split(key, 5)

    # Parameter init matching reset_parameters(): uniform(-stdv, stdv),
    # stdv = sqrt(6 / (1 + num_descriptors + 1)); bias1 = zeros(1).
    stdv = math.sqrt(6.0 / (1 + num_descriptors + 1))
    weight1 = jax.random.uniform(k_w, (1, num_descriptors), jnp.float32,
                                 minval=-stdv, maxval=stdv)
    bias1 = jnp.zeros((1,), jnp.float32)

    coeffs = jax.random.normal(k_c, (1, num_atoms, num_descriptors), jnp.float32)
    coeffs_derivs = jax.random.normal(
        k_cd, (1, 3, num_pairs, num_descriptors), jnp.float32)
    central_atom_index = jax.random.randint(
        k_ci, (num_pairs,), 0, num_atoms, jnp.int32)
    neigh_atom_index = jax.random.randint(
        k_ni, (num_pairs,), 0, num_atoms, jnp.int32)

    e_pa, out_f = net_forward(coeffs, coeffs_derivs, central_atom_index,
                              neigh_atom_index, weight1, bias1)
    jax.block_until_ready((e_pa, out_f))

    # Sanity-check against the pure-JAX reference.
    e_ref, f_ref = net_forward_ref(coeffs, coeffs_derivs, neigh_atom_index,
                                   weight1, bias1)
    assert e_pa.shape == (1,) and out_f.shape == (1, 3, num_atoms)
    assert jnp.allclose(e_pa, e_ref, atol=1e-4, rtol=1e-4)
    assert jnp.allclose(out_f, f_ref, atol=1e-4, rtol=1e-4)

    print("KERNEL_OK")
</pallas_src>

<mosaic_0001>
module attributes {stable_mosaic.version = 11 : i64} {
  func.func @net_force_kernel(%arg0: i32, %arg1: i32, %arg2: memref<3x128x32xf32, #tpu.memory_space<vmem>>, %arg3: memref<1x128xi32, #tpu.memory_space<vmem>>, %arg4: memref<1x32xf32, #tpu.memory_space<vmem>>, %arg5: memref<3x128xf32, #tpu.memory_space<vmem>>, %arg6: memref<128x128xi32, #tpu.memory_space<vmem>>) attributes {dimension_semantics = [#tpu.dimension_semantics<parallel>, #tpu.dimension_semantics<arbitrary>], iteration_bounds = array<i64: 1, 1>, scalar_prefetch = 0 : i64, scratch_operands = 1 : i64, tpu.core_type = #tpu.core_type<tc>, window_params = [{transform_indices = @transform_0, window_bounds = array<i64: 3, 128, 32>}, {transform_indices = @transform_1, window_bounds = array<i64: 1, 128>}, {pipeline_mode = #tpu.pipeline_mode<synchronous>, transform_indices = @transform_2, window_bounds = array<i64: 1, 32>}, {transform_indices = @transform_3, window_bounds = array<i64: 3, 128>}]} {
    %c0_i32 = arith.constant 0 : i32
    %0 = arith.cmpi eq, %arg1, %c0_i32 : i32
    %1 = arith.extui %0 : i1 to i32
    %c0_i32_0 = arith.constant 0 : i32
    %2 = arith.cmpi ne, %1, %c0_i32_0 : i32
    scf.if %2 {
      %cst_15 = arith.constant 0.000000e+00 : f32
      %22 = vector.broadcast %cst_15 : f32 to vector<3x128xf32>
      %c0_16 = arith.constant 0 : index
      %c0_17 = arith.constant 0 : index
      %23 = vector.load %arg5[%c0_16, %c0_17] : memref<3x128xf32, #tpu.memory_space<vmem>>, vector<3x128xf32>
      tpu.vector_store %arg5[%c0_16, %c0_17], %22 {strides = array<i32>} : memref<3x128xf32, #tpu.memory_space<vmem>>, vector<3x128xf32>,
      %24 = tpu.iota {dimensions = array<i32: 1>} : vector<128x128xi32>
      %c0_18 = arith.constant 0 : index
      %c0_19 = arith.constant 0 : index
      %25 = vector.load %arg6[%c0_18, %c0_19] : memref<128x128xi32, #tpu.memory_space<vmem>>, vector<128x128xi32>
      tpu.vector_store %arg6[%c0_18, %c0_19], %24 {strides = array<i32>} : memref<128x128xi32, #tpu.memory_space<vmem>>, vector<128x128xi32>,
    } else {
    }
    %c0 = arith.constant 0 : index
    %c0_1 = arith.constant 0 : index
    %3 = vector.load %arg4[%c0, %c0_1] : memref<1x32xf32, #tpu.memory_space<vmem>>, vector<1x32xf32>
    %c0_2 = arith.constant 0 : index
    %c0_3 = arith.constant 0 : index
    %c0_4 = arith.constant 0 : index
    %4 = vector.load %arg2[%c0_2, %c0_3, %c0_4] : memref<3x128x32xf32, #tpu.memory_space<vmem>>, vector<3x128x32xf32>
    %5 = vector.shape_cast %3 : vector<1x32xf32> to vector<1x1x32xf32>
    %6 = vector.broadcast %5 : vector<1x1x32xf32> to vector<3x128x32xf32>
    %7 = arith.mulf %4, %6 : vector<3x128x32xf32>
    %cst = arith.constant dense<0.000000e+00> : vector<3x128xf32>
    %8 = vector.multi_reduction <add>, %7, %cst [2] : vector<3x128x32xf32> to vector<3x128xf32>
    %cst_5 = arith.constant 0.000000e+00 : f32
    %9 = vector.broadcast %cst_5 : f32 to vector<3x128xf32>
    %10 = arith.subf %9, %8 : vector<3x128xf32>
    %c0_6 = arith.constant 0 : index
    %c0_7 = arith.constant 0 : index
    %11 = vector.load %arg3[%c0_6, %c0_7] : memref<1x128xi32, #tpu.memory_space<vmem>>, vector<1x128xi32>
    %12 = tpu.transpose %11, [1, 0] : vector<1x128xi32> -> vector<128x1xi32>
    %c0_8 = arith.constant 0 : index
    %c0_9 = arith.constant 0 : index
    %13 = vector.load %arg6[%c0_8, %c0_9] : memref<128x128xi32, #tpu.memory_space<vmem>>, vector<128x128xi32>
    %14 = vector.broadcast %12 : vector<128x1xi32> to vector<128x128xi32>
    %15 = arith.cmpi eq, %14, %13 : vector<128x128xi32>
    %16 = arith.extui %15 : vector<128x128xi1> to vector<128x128xi32>
    %17 = arith.sitofp %16 : vector<128x128xi32> to vector<128x128xf32>
    %c0_10 = arith.constant 0 : index
    %c0_11 = arith.constant 0 : index
    %18 = vector.load %arg5[%c0_10, %c0_11] : memref<3x128xf32, #tpu.memory_space<vmem>>, vector<3x128xf32>
    %cst_12 = arith.constant dense<0.000000e+00> : vector<3x128xf32>
    %19 = tpu.matmul %10, %17, %cst_12 {dimension_numbers = #tpu.dot_dimension_numbers<[1], [0], [0], [1], [0, 0, 1, 1], [], []>} : vector<3x128xf32>, vector<128x128xf32>, vector<3x128xf32> -> vector<3x128xf32>
    %20 = arith.addf %18, %19 : vector<3x128xf32>
    %c0_13 = arith.constant 0 : index
    %c0_14 = arith.constant 0 : index
    %21 = vector.load %arg5[%c0_13, %c0_14] : memref<3x128xf32, #tpu.memory_space<vmem>>, vector<3x128xf32>
    tpu.vector_store %arg5[%c0_13, %c0_14], %20 {strides = array<i32>} : memref<3x128xf32, #tpu.memory_space<vmem>>, vector<3x128xf32>,
    return
  }
  func.func @transform_0(%arg0: i32, %arg1: i32) -> (i32, i32, i32) {
    %c1_i32 = arith.constant 1 : i32
    %0 = arith.muli %arg0, %c1_i32 : i32
    %1 = arith.addi %0, %arg1 : i32
    %c0_i32 = arith.constant 0 : i32
    %c0_i32_0 = arith.constant 0 : i32
    %c0_i32_1 = arith.constant 0 : i32
    return %c0_i32, %1, %c0_i32_0 : i32, i32, i32
  }
  func.func @transform_1(%arg0: i32, %arg1: i32) -> (i32, i32) {
    %c1_i32 = arith.constant 1 : i32
    %0 = arith.muli %arg0, %c1_i32 : i32
    %1 = arith.addi %0, %arg1 : i32
    %c0_i32 = arith.constant 0 : i32
    %c0_i32_0 = arith.constant 0 : i32
    return %c0_i32, %1 : i32, i32
  }
  func.func @transform_2(%arg0: i32, %arg1: i32) -> (i32, i32) {
    %c0_i32 = arith.constant 0 : i32
    %c0_i32_0 = arith.constant 0 : i32
    %c0_i32_1 = arith.constant 0 : i32
    return %c0_i32, %c0_i32_0 : i32, i32
  }
  func.func @transform_3(%arg0: i32, %arg1: i32) -> (i32, i32) {
    %c0_i32 = arith.constant 0 : i32
    %c0_i32_0 = arith.constant 0 : i32
    return %c0_i32, %arg0 : i32, i32
  }
}

module attributes {stable_mosaic.version = 11 : i64} {
  func.func @net_force_kernel(%arg0: i32, %arg1: i32, %arg2: memref<3x128x32xf32, #tpu.memory_space<vmem>>, %arg3: memref<128x1xi32, #tpu.memory_space<vmem>>, %arg4: memref<1x32xf32, #tpu.memory_space<vmem>>, %arg5: memref<3x128xf32, #tpu.memory_space<vmem>>, %arg6: memref<128x128xi32, #tpu.memory_space<vmem>>) attributes {dimension_semantics = [#tpu.dimension_semantics<parallel>, #tpu.dimension_semantics<arbitrary>], iteration_bounds = array<i64: 1, 1>, scalar_prefetch = 0 : i64, scratch_operands = 1 : i64, tpu.core_type = #tpu.core_type<tc>, window_params = [{transform_indices = @transform_0, window_bounds = array<i64: 3, 128, 32>}, {transform_indices = @transform_1, window_bounds = array<i64: 128, 1>}, {pipeline_mode = #tpu.pipeline_mode<synchronous>, transform_indices = @transform_2, window_bounds = array<i64: 1, 32>}, {transform_indices = @transform_3, window_bounds = array<i64: 3, 128>}]} {
    %c0_i32 = arith.constant 0 : i32
    %0 = arith.cmpi eq, %arg1, %c0_i32 : i32
    %1 = arith.extui %0 : i1 to i32
    %c0_i32_0 = arith.constant 0 : i32
    %2 = arith.cmpi ne, %1, %c0_i32_0 : i32
    scf.if %2 {
      %cst_15 = arith.constant 0.000000e+00 : f32
      %21 = vector.broadcast %cst_15 : f32 to vector<3x128xf32>
      %c0_16 = arith.constant 0 : index
      %c0_17 = arith.constant 0 : index
      %22 = vector.load %arg5[%c0_16, %c0_17] : memref<3x128xf32, #tpu.memory_space<vmem>>, vector<3x128xf32>
      tpu.vector_store %arg5[%c0_16, %c0_17], %21 {strides = array<i32>} : memref<3x128xf32, #tpu.memory_space<vmem>>, vector<3x128xf32>,
      %23 = tpu.iota {dimensions = array<i32: 1>} : vector<128x128xi32>
      %c0_18 = arith.constant 0 : index
      %c0_19 = arith.constant 0 : index
      %24 = vector.load %arg6[%c0_18, %c0_19] : memref<128x128xi32, #tpu.memory_space<vmem>>, vector<128x128xi32>
      tpu.vector_store %arg6[%c0_18, %c0_19], %23 {strides = array<i32>} : memref<128x128xi32, #tpu.memory_space<vmem>>, vector<128x128xi32>,
    } else {
    }
    %c0 = arith.constant 0 : index
    %c0_1 = arith.constant 0 : index
    %3 = vector.load %arg4[%c0, %c0_1] : memref<1x32xf32, #tpu.memory_space<vmem>>, vector<1x32xf32>
    %c0_2 = arith.constant 0 : index
    %c0_3 = arith.constant 0 : index
    %c0_4 = arith.constant 0 : index
    %4 = vector.load %arg2[%c0_2, %c0_3, %c0_4] : memref<3x128x32xf32, #tpu.memory_space<vmem>>, vector<3x128x32xf32>
    %5 = vector.shape_cast %3 : vector<1x32xf32> to vector<1x1x32xf32>
    %6 = vector.broadcast %5 : vector<1x1x32xf32> to vector<3x128x32xf32>
    %7 = arith.mulf %4, %6 : vector<3x128x32xf32>
    %cst = arith.constant dense<0.000000e+00> : vector<3x128xf32>
    %8 = vector.multi_reduction <add>, %7, %cst [2] : vector<3x128x32xf32> to vector<3x128xf32>
    %cst_5 = arith.constant 0.000000e+00 : f32
    %9 = vector.broadcast %cst_5 : f32 to vector<3x128xf32>
    %10 = arith.subf %9, %8 : vector<3x128xf32>
    %c0_6 = arith.constant 0 : index
    %c0_7 = arith.constant 0 : index
    %11 = vector.load %arg3[%c0_6, %c0_7] : memref<128x1xi32, #tpu.memory_space<vmem>>, vector<128x1xi32>
    %c0_8 = arith.constant 0 : index
    %c0_9 = arith.constant 0 : index
    %12 = vector.load %arg6[%c0_8, %c0_9] : memref<128x128xi32, #tpu.memory_space<vmem>>, vector<128x128xi32>
    %13 = vector.broadcast %11 : vector<128x1xi32> to vector<128x128xi32>
    %14 = arith.cmpi eq, %13, %12 : vector<128x128xi32>
    %15 = arith.extui %14 : vector<128x128xi1> to vector<128x128xi32>
    %16 = arith.sitofp %15 : vector<128x128xi32> to vector<128x128xf32>
    %c0_10 = arith.constant 0 : index
    %c0_11 = arith.constant 0 : index
    %17 = vector.load %arg5[%c0_10, %c0_11] : memref<3x128xf32, #tpu.memory_space<vmem>>, vector<3x128xf32>
    %cst_12 = arith.constant dense<0.000000e+00> : vector<3x128xf32>
    %18 = tpu.matmul %10, %16, %cst_12 {dimension_numbers = #tpu.dot_dimension_numbers<[1], [0], [0], [1], [0, 0, 1, 1], [], []>} : vector<3x128xf32>, vector<128x128xf32>, vector<3x128xf32> -> vector<3x128xf32>
    %19 = arith.addf %17, %18 : vector<3x128xf32>
    %c0_13 = arith.constant 0 : index
    %c0_14 = arith.constant 0 : index
    %20 = vector.load %arg5[%c0_13, %c0_14] : memref<3x128xf32, #tpu.memory_space<vmem>>, vector<3x128xf32>
    tpu.vector_store %arg5[%c0_13, %c0_14], %19 {strides = array<i32>} : memref<3x128xf32, #tpu.memory_space<vmem>>, vector<3x128xf32>,
    return
  }
  func.func @transform_0(%arg0: i32, %arg1: i32) -> (i32, i32, i32) {
    %c1_i32 = arith.constant 1 : i32
    %0 = arith.muli %arg0, %c1_i32 : i32
    %1 = arith.addi %0, %arg1 : i32
    %c0_i32 = arith.constant 0 : i32
    %c0_i32_0 = arith.constant 0 : i32
    %c0_i32_1 = arith.constant 0 : i32
    return %c0_i32, %1, %c0_i32_0 : i32, i32, i32
  }
  func.func @transform_1(%arg0: i32, %arg1: i32) -> (i32, i32) {
    %c1_i32 = arith.constant 1 : i32
    %0 = arith.muli %arg0, %c1_i32 : i32
    %1 = arith.addi %0, %arg1 : i32
    %c0_i32 = arith.constant 0 : i32
    %c0_i32_0 = arith.constant 0 : i32
    return %1, %c0_i32 : i32, i32
  }
  func.func @transform_2(%arg0: i32, %arg1: i32) -> (i32, i32) {
    %c0_i32 = arith.constant 0 : i32
    %c0_i32_0 = arith.constant 0 : i32
    %c0_i32_1 = arith.constant 0 : i32
    return %c0_i32, %c0_i32_0 : i32, i32
  }
  func.func @transform_3(%arg0: i32, %arg1: i32) -> (i32, i32) {
    %c0_i32 = arith.constant 0 : i32
    %c0_i32_0 = arith.constant 0 : i32
    return %c0_i32, %arg0 : i32, i32
  }
}

</mosaic_0001>

<bundles_post_ra>
// kernel: tpu_custom_call.1
= control target key start
LH: loop header
LB: loop body
LE: loop exit
PB: predicated region body
PF: predicated region fallthrough
CT: control target
= control target key end

     0   :  { %vm177_vm0 = vcmask 261120   ;;  %v1074_v7 = vmov 0   ;;  %s1592_s0 = inlined_call_operand.vmem [shape: f32[3,128,32], index: 0, kind: input, shape index: {}]   ;;  %s1593_s1 = inlined_call_operand.vmem [shape: s32[1,128], index: 1, kind: input, shape index: {}]   ;;  %s1594_s2 = inlined_call_operand.vmem [shape: f32[1,32], index: 2, kind: input, shape index: {}]   ;;  %s1595_s3 = inlined_call_operand.hbm [shape: f32[3,128], index: 3, kind: output, shape index: {}]  }
   0x1   :  { %v370_v0 = vld [vmem:[%s1593_s1] sm:$0x1]  ;;  %v76_v4 = vld [vmem:[%s1592_s0 + $0x8] sm:$0xff]  ;;  %1049 = vset.pattern.permute.xlu1 %v1074_v7  ;;  %v77_v14 = vld [vmem:[%s1592_s0 + $0x10] sm:$0xff] }
   0x2   :  { %v1106_v1 = vld [vmem:[%s1594_s2] ss:$0 sm:$0xff]  ;;  %371 = vxpose.xlu0.b32.start.end [1/1] (short) %v370_v0, 128  ;;  %v92_v11 = vld [vmem:[%s1592_s0 + $0x88] sm:$0xff] }
   0x3   :  { %v75_v2 = vld [vmem:[%s1592_s0] sm:$0xff]  ;;  %v130_v5 = vmul.f32 %v1106_v1, %v76_v4  ;;  %v146_v13 = vmul.f32 %v1106_v1, %v92_v11 }
   0x4   :  { %v129_v3 = vmul.f32 %v1106_v1, %v75_v2  ;;  %v91_v6 = vld [vmem:[%s1592_s0 + $0x80] sm:$0xff] }
   0x5   :  { %v181_v9 = vsel %vm177_vm0, %v130_v5, 0.0  ;;  %v145_v10 = vmul.f32 %v1106_v1, %v91_v6 }
   0x6   :  { %v178_v8 = vsel %vm177_vm0, %v129_v3, 0.0 }
   0x7   :  { %179 = vadd.xlane.f32.xlu1 %v178_v8  ;;  %v226_v12 = vsel %vm177_vm0, %v145_v10, 0.0 }
   0xb   :  { %182 = vadd.xlane.f32.xlu1 %v181_v9 }
   0xc   :  { %8 = vsyncpa [#allocation4], 0  ;;  %v229_v15 = vsel %vm177_vm0, %v146_v13, 0.0  ;;  %v131_v16 = vmul.f32 %v1106_v1, %v77_v14  ;;  %v93_v17 = vld [vmem:[%s1592_s0 + $0x90] sm:$0xff]  ;;  %v107_v20 = vld [vmem:[%s1592_s0 + $0x100] sm:$0xff]  ;;  %vm575_vm1 = vcmask 130112  }
   0xd   :  { %v147_v19 = vmul.f32 %v1106_v1, %v93_v17  ;;  %v161_v22 = vmul.f32 %v1106_v1, %v107_v20  ;;  %v108_v23 = vld [vmem:[%s1592_s0 + $0x108] sm:$0xff]  ;;  %v78_v26 = vld [vmem:[%s1592_s0 + $0x18] sm:$0xff]  ;;  %v109_v32 = vld [vmem:[%s1592_s0 + $0x110] sm:$0xff]  ;;  %vm582_vm2 = vcmask 195712   ;;  %vm589_vm3 = vcmask 261312  }
   0xe   :  { %v184_v18 = vsel %vm177_vm0, %v131_v16, 0.0  ;;  %v162_v25 = vmul.f32 %v1106_v1, %v108_v23  ;;  %v132_v28 = vmul.f32 %v1106_v1, %v78_v26  ;;  %v94_v29 = vld [vmem:[%s1592_s0 + $0x98] sm:$0xff]  ;;  %v163_v34 = vmul.f32 %v1106_v1, %v109_v32  ;;  %v79_v35 = vld [vmem:[%s1592_s0 + $0x20] sm:$0xff]  ;;  %v96_v44 = vld [vmem:[%s1592_s0 + $0xa8] sm:$0xff] }
   0xf   :  { %227 = vadd.xlane.f32.xlu1 %v226_v12  ;;  %v232_v21 = vsel %vm177_vm0, %v147_v19, 0.0  ;;  %v274_v24 = vsel %vm177_vm0, %v161_v22, 0.0  ;;  %v148_v31 = vmul.f32 %v1106_v1, %v94_v29  ;;  %v133_v37 = vmul.f32 %v1106_v1, %v79_v35  ;;  %v95_v38 = vld [vmem:[%s1592_s0 + $0xa0] sm:$0xff]  ;;  %v110_v41 = vld [vmem:[%s1592_s0 + $0x118] sm:$0xff]  ;;  %v113_v50 = vld [vmem:[%s1592_s0 + $0x130] sm:$0xff] }
  0x10   :  { %v277_v27 = vsel %vm177_vm0, %v162_v25, 0.0  ;;  %v187_v30 = vsel %vm177_vm0, %v132_v28, 0.0  ;;  %v280_v36 = vsel %vm177_vm0, %v163_v34, 0.0  ;;  %v149_v40 = vmul.f32 %v1106_v1, %v95_v38  ;;  %v82_v47 = vld [vmem:[%s1592_s0 + $0x38] sm:$0xff]  ;;  %v99_v53 = vld [vmem:[%s1592_s0 + $0xc0] sm:$0xff]  ;;  %v84_v56 = vld [vmem:[%s1592_s0 + $0x48] sm:$0xff] }
  0x11   :  { %v235_v33 = vsel %vm177_vm0, %v148_v31, 0.0  ;;  %v190_v39 = vsel %vm177_vm0, %v133_v37, 0.0  ;;  %v164_v43 = vmul.f32 %v1106_v1, %v110_v41  ;;  %v150_v46 = vmul.f32 %v1106_v1, %v96_v44  ;;  %v115_v59 = vld [vmem:[%s1592_s0 + $0x140] sm:$0xff]  ;;  %v101_v62 = vld [vmem:[%s1592_s0 + $0xd0] sm:$0xff]  ;;  %v86_v2 = vld [vmem:[%s1592_s0 + $0x58] sm:$0xff] }
  0x12   :  { %v238_v42 = vsel %vm177_vm0, %v149_v40, 0.0  ;;  %v136_v49 = vmul.f32 %v1106_v1, %v82_v47  ;;  %v167_v52 = vmul.f32 %v1106_v1, %v113_v50  ;;  %v153_v55 = vmul.f32 %v1106_v1, %v99_v53  ;;  %v117_v5 = vld [vmem:[%s1592_s0 + $0x150] sm:$0xff]  ;;  %v103_v8 = vld [vmem:[%s1592_s0 + $0xe0] sm:$0xff]  ;;  %v88_v11 = vld [vmem:[%s1592_s0 + $0x68] sm:$0xff] }
  0x13   :  { %230 = vadd.xlane.f32.xlu1 %v229_v15  ;;  %v283_v45 = vsel %vm177_vm0, %v164_v43, 0.0  ;;  %v241_v48 = vsel %vm177_vm0, %v150_v46, 0.0  ;;  %v138_v58 = vmul.f32 %v1106_v1, %v84_v56  ;;  %v169_v61 = vmul.f32 %v1106_v1, %v115_v59  ;;  %v119_v14 = vld [vmem:[%s1592_s0 + $0x160] sm:$0xff]  ;;  %v105_v17 = vld [vmem:[%s1592_s0 + $0xf0] sm:$0xff]  ;;  %v90_v20 = vld [vmem:[%s1592_s0 + $0x78] sm:$0xff] }
  0x14   :  { %v199_v51 = vsel %vm177_vm0, %v136_v49, 0.0  ;;  %v292_v54 = vsel %vm177_vm0, %v167_v52, 0.0  ;;  %v250_v57 = vsel %vm177_vm0, %v153_v55, 0.0  ;;  %v155_v0 = vmul.f32 %v1106_v1, %v101_v62  ;;  %v121_v23 = vld [vmem:[%s1592_s0 + $0x170] sm:$0xff]  ;;  %v111_v52 = vld [vmem:[%s1592_s0 + $0x120] sm:$0xff] }
  0x15   :  { %v205_v60 = vsel %vm177_vm0, %v138_v58, 0.0  ;;  %v298_v63 = vsel %vm177_vm0, %v169_v61, 0.0  ;;  %v140_v4 = vmul.f32 %v1106_v1, %v86_v2  ;;  %v157_v10 = vmul.f32 %v1106_v1, %v103_v8 }
  0x16   :  { %v256_v3 = vsel %vm177_vm0, %v155_v0, 0.0  ;;  %v142_v13 = vmul.f32 %v1106_v1, %v88_v11  ;;  %v173_v16 = vmul.f32 %v1106_v1, %v119_v14  ;;  %v159_v19 = vmul.f32 %v1106_v1, %v105_v17  ;;  %v112_v14 = vld [vmem:[%s1592_s0 + $0x128] sm:$0xff] }
  0x17   :  { %185 = vadd.xlane.f32.xlu1 %v184_v18  ;;  %v211_v6 = vsel %vm177_vm0, %v140_v4, 0.0  ;;  %v262_v12 = vsel %vm177_vm0, %v157_v10, 0.0  ;;  %v144_v22 = vmul.f32 %v1106_v1, %v90_v20  ;;  %v175_v25 = vmul.f32 %v1106_v1, %v121_v23 }
  0x18   :  { %v217_v15 = vsel %vm177_vm0, %v142_v13, 0.0  ;;  %v310_v18 = vsel %vm177_vm0, %v173_v16, 0.0  ;;  %v1075_v29 = vmov 0.0|0.0   ;;  %v165_v59 = vmul.f32 %v1106_v1, %v111_v52 }
  0x19   :  { %v316_v26 = vsel %vm177_vm0, %v175_v25, 0.0  ;;  %1018 = vmatprep.subr.bf16.mxu0 %v1075_v29  ;;  %vm596_vm4 = vcmask 326912   ;;  %vm603_vm5 = vcmask 392512   ;;  %vm1078_vm12 = vmmov 0  }
  0x1a   :  { %v286_v4 = vsel %vm177_vm0, %v165_v59, 0.0  ;;  %vm610_vm13 = vcmask 458112   ;;  %vm617_vm14 = vcmask 523712   ;;  %vm624_vm15 = vcmask 589312  }
  0x1b   :  { %233 = vadd.xlane.f32.xlu1 %v232_v21  ;;  %v268_v21 = vsel %vm177_vm0, %v159_v19, 0.0 }
  0x1f   :  { %275 = vadd.xlane.f32.xlu1 %v274_v24  ;;  %v223_v24 = vsel %vm177_vm0, %v144_v22, 0.0  ;;  %v98_v22 = vld [vmem:[%s1592_s0 + $0xb8] sm:$0xff] }
  0x23   :  { %278 = vadd.xlane.f32.xlu1 %v277_v27 }
  0x27   :  { %188 = vadd.xlane.f32.xlu1 %v187_v30  ;;  %v56_v30 = vlaneseq }
  0x29   :  { %v1254_v32 = vand.u32 127, %v56_v30 }
  0x2b   :  { %236 = vadd.xlane.f32.xlu1 %v235_v33  ;;  %1048 = vset.pattern.permute.xlu0 %v1074_v7  ;;  %v171_v7 = vmul.f32 %v1106_v1, %v117_v5  ;;  %v1256_v33 = vshrl.u32 %v56_v30, 7  ;;  %v152_v30 = vmul.f32 %v1106_v1, %v98_v22 }
  0x2d   :  { %v304_v9 = vsel %vm177_vm0, %v171_v7, 0.0  ;;  %v568_v35 = vsub.s32 %v1254_v32, %v1256_v33 }
  0x2f   :  { %281 = vadd.xlane.f32.xlu1 %v280_v36  ;;  %v570_v36 = vadd.s32 4294967288, %v1254_v32 }
  0x31   :  { %v573_v41 = vsub.s32 %v570_v36, %v1256_v33 }
  0x33   :  { %191 = vadd.xlane.f32.xlu1 %v190_v39 }
  0x37   :  { %239 = vadd.xlane.f32.xlu1 %v238_v42 }
  0x3b   :  { %284 = vadd.xlane.f32.xlu1 %v283_v45  ;;  %v80_v45 = vld [vmem:[%s1592_s0 + $0x28] sm:$0xff] }
  0x3f   :  { %242 = vadd.xlane.f32.xlu1 %v241_v48 }
  0x43   :  { %200 = vadd.xlane.f32.xlu1 %v199_v51  ;;  %v134_v51 = vmul.f32 %v1106_v1, %v80_v45 }
  0x45   :  { %v193_v58 = vsel %vm177_vm0, %v134_v51, 0.0  ;;  %v100_v51 = vld [vmem:[%s1592_s0 + $0xc8] sm:$0xff] }
  0x47   :  { %293 = vadd.xlane.f32.xlu1 %v292_v54  ;;  %v577_v54 = vadd.s32 4294967280, %v1254_v32 }
  0x49   :  { %v1281_v62 = vsub.s32 %v577_v54, %v1256_v33 }
  0x4b   :  { %251 = vadd.xlane.f32.xlu1 %v250_v57 }
  0x4f   :  { %206 = vadd.xlane.f32.xlu1 %v205_v60  ;;  %v81_v60 = vld [vmem:[%s1592_s0 + $0x30] sm:$0xff] }
  0x50   :  { %v135_v5 = vmul.f32 %v1106_v1, %v81_v60  ;;  %v154_v60 = vmul.f32 %v1106_v1, %v100_v51 }
  0x53   :  { %299 = vadd.xlane.f32.xlu1 %v298_v63 }
  0x57   :  { %257 = vadd.xlane.f32.xlu1 %v256_v3 }
  0x5b   :  { %212 = vadd.xlane.f32.xlu1 %v211_v6  ;;  %v97_v6 = vld [vmem:[%s1592_s0 + $0xb0] sm:$0xff] }
  0x5c   :  { %v151_v13 = vmul.f32 %v1106_v1, %v97_v6  ;;  %v253_v6 = vsel %vm177_vm0, %v154_v60, 0.0 }
  0x5e   :  { %v244_v20 = vsel %vm177_vm0, %v151_v13, 0.0 }
  0x5f   :  { %305 = vadd.xlane.f32.xlu1 %v304_v9 }
  0x63   :  { %263 = vadd.xlane.f32.xlu1 %v262_v12  ;;  %v196_v12 = vsel %vm177_vm0, %v135_v5, 0.0 }
  0x67   :  { %218 = vadd.xlane.f32.xlu1 %v217_v15 }
  0x6b   :  { %311 = vadd.xlane.f32.xlu1 %v310_v18 }
  0x6f   :  { %269 = vadd.xlane.f32.xlu1 %v268_v21  ;;  %v166_v21 = vmul.f32 %v1106_v1, %v112_v14 }
  0x73   :  { %224 = vadd.xlane.f32.xlu1 %v223_v24  ;;  %v584_v24 = vadd.s32 4294967272, %v1254_v32 }
  0x75   :  { %v587_v36 = vsub.s32 %v584_v24, %v1256_v33 }
  0x77   :  { %317 = vadd.xlane.f32.xlu1 %v316_v26 }
  0x82   :  { %v387_v27 = vpop.trf.xlu0 }
  0x83   :  { %420 = vperm.xlu0 %1048, %v387_v27  }
  0x86   :  { %v388_v28 = vpop.trf.xlu0 }
  0x88   :  { %423 = vperm.xlu1 %1049, %v388_v28   ;;  %v289_v28 = vsel %vm177_vm0, %v166_v21, 0.0 }
  0x8a   :  { %v389_v31 = vpop.trf.xlu0 }
  0x8c   :  { %426 = vperm.xlu1 %1049, %v389_v31   ;;  %v83_v31 = vld [vmem:[%s1592_s0 + $0x40] sm:$0xff] }
  0x8e   :  { %v390_v34 = vpop.trf.xlu0 }
  0x90   :  { %429 = vperm.xlu1 %1049, %v390_v34  }
  0x92   :  { %v391_v38 = vpop.trf.xlu0 }
  0x94   :  { %v180_v37 = vpop.xlane.xlu1 %179  ;;  %432 = vperm.xlu1 %1049, %v391_v38  }
  0x95   :  { %v322_v39 = vsub.f32 0.0, %v180_v37 }
  0x96   :  { %v1262_v43 = vpop.trf.xlu0 }
  0x97   :  { %v569_v40 = vrot.slane %v322_v39, %v568_v35 }
  0x98   :  { %v183_v42 = vpop.xlane.xlu1 %182 }
  0x99   :  { %v323_v44 = vsub.f32 0.0, %v183_v42  ;;  %v137_v42 = vmul.f32 %v1106_v1, %v83_v31 }
  0x9a   :  { %v393_v48 = vpop.trf.xlu0 }
  0x9b   :  { %v574_v46 = vrot.slane %v323_v44, %v573_v41  ;;  %438 = vperm.xlu1 %1049, %v393_v48   ;;  %v114_v44 = vld [vmem:[%s1592_s0 + $0x138] sm:$0xff] }
  0x9c   :  { %v228_v47 = vpop.xlane.xlu1 %227 }
  0x9d   :  { %v576_v49 = vsel %vm575_vm1, %v574_v46, %v569_v40  ;;  %v338_v50 = vsub.f32 0.0, %v228_v47  ;;  %v247_v40 = vsel %vm177_vm0, %v152_v30, 0.0 }
  0x9e   :  { %v1273_v56 = vpop.trf.xlu0 }
  0x9f   :  { %v678_v53 = vrot.slane %v338_v50, %v568_v35  ;;  %v168_v50 = vmul.f32 %v1106_v1, %v114_v44 }
  0xa0   :  { %v231_v55 = vpop.xlane.xlu1 %230 }
  0xa1   :  { %v339_v57 = vsub.f32 0.0, %v231_v55  ;;  %v295_v59 = vsel %vm177_vm0, %v168_v50, 0.0 }
  0xa2   :  { %194 = vadd.xlane.f32.xlu0 %v193_v58  ;;  %v395_v0 = vpop.trf.xlu0 }
  0xa3   :  { %v682_v61 = vrot.slane %v339_v57, %v573_v41  ;;  %444 = vperm.xlu1 %1049, %v395_v0  }
  0xa4   :  { %v186_v63 = vpop.xlane.xlu1 %185 }
  0xa5   :  { %v683_v2 = vsel %vm575_vm1, %v682_v61, %v678_v53  ;;  %v324_v3 = vsub.f32 0.0, %v186_v63  ;;  %v591_v53 = vadd.s32 4294967264, %v1254_v32  ;;  %v85_v61 = vld [vmem:[%s1592_s0 + $0x50] sm:$0xff] }
  0xa6   :  { %287 = vadd.xlane.f32.xlu0 %v286_v4  ;;  %v1290_v9 = vpop.trf.xlu0 }
  0xa7   :  { %v581_v7 = vrot.slane %v324_v3, %v1281_v62  ;;  %v1337_v0 = vsub.s32 %v591_v53, %v1256_v33 }
  0xa8   :  { %v234_v8 = vpop.xlane.xlu1 %233 }
  0xa9   :  { %v583_v10 = vsel %vm582_vm2, %v581_v7, %v576_v49  ;;  %v340_v11 = vsub.f32 0.0, %v234_v8  ;;  %v202_v49 = vsel %vm177_vm0, %v137_v42, 0.0  ;;  %v139_v7 = vmul.f32 %v1106_v1, %v85_v61  ;;  %v116_v8 = vld [vmem:[%s1592_s0 + $0x148] sm:$0xff] }
  0xaa   :  { %197 = vadd.xlane.f32.xlu0 %v196_v12  ;;  %v397_v17 = vpop.trf.xlu0  ;;  %v170_v14 = vmul.f32 %v1106_v1, %v116_v8 }
  0xab   :  { %v687_v15 = vrot.slane %v340_v11, %v1281_v62  ;;  %450 = vperm.xlu1 %1049, %v397_v17   ;;  %v208_v13 = vsel %vm177_vm0, %v139_v7, 0.0  ;;  %v598_v17 = vadd.s32 4294967256, %v1254_v32 }
  0xac   :  { %v276_v16 = vpop.xlane.xlu1 %275  ;;  %v301_v21 = vsel %vm177_vm0, %v170_v14, 0.0 }
  0xad   :  { %v688_v18 = vsel %vm582_vm2, %v687_v15, %v683_v2  ;;  %v354_v19 = vsub.f32 0.0, %v276_v16  ;;  %v102_v15 = vld [vmem:[%s1592_s0 + $0xd8] sm:$0xff] }
  0xae   :  { %245 = vadd.xlane.f32.xlu0 %v244_v20  ;;  %v1306_v26 = vpop.trf.xlu0  ;;  %v156_v22 = vmul.f32 %v1106_v1, %v102_v15 }
  0xaf   :  { %v757_v23 = vrot.slane %v354_v19, %v568_v35 }
  0xb0   :  { %v279_v25 = vpop.xlane.xlu1 %278 }
  0xb1   :  { %v355_v27 = vsub.f32 0.0, %v279_v25  ;;  %v1363_v25 = vsub.s32 %v598_v17, %v1256_v33 }
  0xb2   :  { %290 = vadd.xlane.f32.xlu0 %v289_v28  ;;  %v399_v37 = vpop.trf.xlu0 }
  0xb3   :  { %v761_v34 = vrot.slane %v355_v27, %v573_v41  ;;  %456 = vperm.xlu1 %1049, %v399_v37   ;;  %v612_v27 = vadd.s32 4294967240, %v1254_v32 }
  0xb4   :  { %v189_v35 = vpop.xlane.xlu1 %188 }
  0xb5   :  { %v762_v38 = vsel %vm575_vm1, %v761_v34, %v757_v23  ;;  %v325_v39 = vsub.f32 0.0, %v189_v35  ;;  %v87_v23 = vld [vmem:[%s1592_s0 + $0x60] sm:$0xff]  ;;  %v259_v35 = vsel %vm177_vm0, %v156_v22, 0.0  ;;  %vm638_vm1 = vcmask 720512  }
  0xb6   :  { %248 = vadd.xlane.f32.xlu0 %v247_v40  ;;  %v400_v46 = vpop.trf.xlu0  ;;  %v141_v30 = vmul.f32 %v1106_v1, %v87_v23 }
  0xb7   :  { %v588_v45 = vrot.slane %v325_v39, %v587_v36  ;;  %459 = vperm.xlu1 %1049, %v400_v46   ;;  %v104_v46 = vld [vmem:[%s1592_s0 + $0xe8] sm:$0xff] }
  0xb8   :  { %v237_v41 = vpop.xlane.xlu1 %236  ;;  %v214_v40 = vsel %vm177_vm0, %v141_v30, 0.0  ;;  %v158_v53 = vmul.f32 %v1106_v1, %v104_v46 }
  0xb9   :  { %v590_v47 = vsel %vm589_vm3, %v588_v45, %v583_v10  ;;  %v341_v48 = vsub.f32 0.0, %v237_v41  ;;  %v605_v45 = vadd.s32 4294967248, %v1254_v32 }
  0xba   :  { %203 = vadd.xlane.f32.xlu0 %v202_v49  ;;  %v1327_v55 = vpop.trf.xlu0 }
  0xbb   :  { %v692_v52 = vrot.slane %v341_v48, %v587_v36  ;;  %v619_v48 = vadd.s32 4294967232, %v1254_v32  ;;  %v1392_v51 = vsub.s32 %v605_v45, %v1256_v33 }
  0xbc   :  { %v282_v54 = vpop.xlane.xlu1 %281 }
  0xbd   :  { %v693_v57 = vsel %vm589_vm3, %v692_v52, %v688_v18  ;;  %v356_v58 = vsub.f32 0.0, %v282_v54  ;;  %v89_v54 = vld [vmem:[%s1592_s0 + $0x70] sm:$0xff] }
  0xbe   :  { %296 = vadd.xlane.f32.xlu0 %v295_v59  ;;  %v402_v3 = vpop.trf.xlu0  ;;  %v626_v59 = vadd.s32 4294967224, %v1254_v32 }
  0xbf   :  { %v766_v63 = vrot.slane %v356_v58, %v1281_v62  ;;  %465 = vperm.xlu1 %1049, %v402_v3   ;;  %v1403_v58 = vsub.s32 %v619_v48, %v1256_v33  ;;  %v120_v3 = vld [vmem:[%s1592_s0 + $0x168] sm:$0xff] }
  0xc0   :  { %v192_v2 = vpop.xlane.xlu1 %191 }
  0xc1   :  { %v767_v4 = vsel %vm582_vm2, %v766_v63, %v762_v38  ;;  %v326_v5 = vsub.f32 0.0, %v192_v2  ;;  %v1376_v38 = vsub.s32 %v612_v27, %v1256_v33  ;;  %v265_v63 = vsel %vm177_vm0, %v158_v53, 0.0 }
  0xc2   :  { %254 = vadd.xlane.f32.xlu0 %v253_v6  ;;  %v143_v2 = vmul.f32 %v1106_v1, %v89_v54  ;;  %vm645_vm2 = vcmask 786112  }
  0xc3   :  { %v595_v62 = vrot.slane %v326_v5, %v1337_v0  ;;  %v1415_v5 = vsub.s32 %v626_v59, %v1256_v33  ;;  %v661_v59 = vadd.s32 4294967184, %v1254_v32 }
  0xc4   :  { %v240_v10 = vpop.xlane.xlu1 %239  ;;  %v220_v8 = vsel %vm177_vm0, %v143_v2, 0.0 }
  0xc5   :  { %v1347_v11 = vsel %vm596_vm4, %v595_v62, %v590_v47  ;;  %v342_v12 = vsub.f32 0.0, %v240_v10  ;;  %v174_v62 = vmul.f32 %v1106_v1, %v120_v3  ;;  %v106_v10 = vld [vmem:[%s1592_s0 + $0xf8] sm:$0xff]  ;;  %v1472_v2 = vsub.s32 %v661_v59, %v1256_v33 }
  0xc6   :  { %209 = vadd.xlane.f32.xlu0 %v208_v13  ;;  %v633_v13 = vadd.s32 4294967216, %v1254_v32  ;;  %v160_v17 = vmul.f32 %v1106_v1, %v106_v10  ;;  %v668_v3 = vadd.s32 4294967176, %v1254_v32 }
  0xc7   :  { %v697_v16 = vrot.slane %v342_v12, %v1337_v0 }
  0xc8   :  { %v285_v18 = vpop.xlane.xlu1 %284 }
  0xc9   :  { %v698_v19 = vsel %vm596_vm4, %v697_v16, %v693_v57  ;;  %v357_v20 = vsub.f32 0.0, %v285_v18  ;;  %v313_v16 = vsel %vm177_vm0, %v174_v62, 0.0  ;;  %v122_v18 = vld [vmem:[%s1592_s0 + $0x178] sm:$0xff]  ;;  %v1479_v62 = vsub.s32 %v668_v3, %v1256_v33 }
  0xca   :  { %302 = vadd.xlane.f32.xlu0 %v301_v21  ;;  %v640_v21 = vadd.s32 4294967208, %v1254_v32  ;;  %v176_v27 = vmul.f32 %v1106_v1, %v122_v18 }
  0xcb   :  { %v771_v24 = vrot.slane %v357_v20, %v587_v36  ;;  %v118_v36 = vld [vmem:[%s1592_s0 + $0x158] sm:$0xff]  ;;  %v1435_v20 = vsub.s32 %v633_v13, %v1256_v33  ;;  %s1079_s0 = smov [#allocation3]  }
  0xcc   :  { %v243_v28 = vpop.xlane.xlu1 %242  ;;  %v172_v41 = vmul.f32 %v1106_v1, %v118_v36  ;;  %v1444_v30 = vsub.s32 %v640_v21, %v1256_v33  ;;  %v319_v36 = vsel %vm177_vm0, %v176_v27, 0.0  ;;  %s916_s23 = sshll.u32 %s1079_s0, 4  ;;  %s917_s23 = int_to_ptr.vmem [resolvable:$true] %s916_s23 }
  0xcd   :  { %v1368_v31 = vsel %vm589_vm3, %v771_v24, %v767_v4  ;;  %v343_v34 = vsub.f32 0.0, %v243_v28  ;;  %v271_v24 = vsel %vm177_vm0, %v160_v17, 0.0  ;;  %vm652_vm3 = vcmask 851712   ;;  %s1050_s24 = scalar_lea.vmem %s917_s23, 64  ;;  %p1055_p1 = scmp.lt.s32.totalorder %s917_s23, %s917_s23 }
  0xce   :  { %260 = vadd.xlane.f32.xlu0 %v259_v35  ;;  %v307_v52 = vsel %vm177_vm0, %v172_v41, 0.0  ;;  %v654_v41 = vadd.s32 4294967192, %v1254_v32  ;;  %vm631_vm0 = vcmask 654912   ;;  %p1051_p0 = scmp.ne.s32.totalorder %s917_s23, %s1050_s24  ;;  %p1056_p2 = scmp.lt.s32.totalorder %s1050_s24, %s1050_s24 }
  0xcf   :  { %v702_v37 = vrot.slane %v343_v34, %v1363_v25 }
  0xd0   :  { %v201_v39 = vpop.xlane.xlu1 %200  ;;  %p1057_p3 = por %p1056_p2, %p1055_p1 }
  0xd1   :  { %v1380_v42 = vsel %vm603_vm5, %v702_v37, %v698_v19  ;;  %v329_v44 = vsub.f32 0.0, %v201_v39  ;;  %v647_v39 = vadd.s32 4294967200, %v1254_v32 }
  0xd2   :  { %215 = vadd.xlane.f32.xlu0 %v214_v40  ;;  %p1058_p4 = pnand %p1057_p3, %p1051_p0 }
  0xd3   :  { %v1388_v47 = vrot.slane %v329_v44, %v1376_v38  ;;  %v1455_v45 = vsub.s32 %v647_v39, %v1256_v33 }
  0xd4   :  { %v294_v49 = vpop.xlane.xlu1 %293 }
  0xd5   :  { %v360_v50 = vsub.f32 0.0, %v294_v49 }
  0xd6   :  { %308 = vadd.xlane.f32.xlu0 %v307_v52 }
  0xd7   :  { %v1400_v57 = vrot.slane %v360_v50, %v1392_v51  ;;  %v1462_v50 = vsub.s32 %v654_v41, %v1256_v33  ;;  %v1076_v33 = vmov 1.0|1.0  }
  0xd8   :  { %v252_v60 = vpop.xlane.xlu1 %251 }
  0xd9   :  { %v346_v61 = vsub.f32 0.0, %v252_v60 }
  0xda   :  { %266 = vadd.xlane.f32.xlu0 %v265_v63 }
  0xdb   :  { %v1412_v4 = vrot.slane %v346_v61, %v1403_v58 }
  0xdc   :  { %v207_v6 = vpop.xlane.xlu1 %206 }
  0xdd   :  { %v331_v7 = vsub.f32 0.0, %v207_v6 }
  0xde   :  { %221 = vadd.xlane.f32.xlu0 %v220_v8 }
  0xdf   :  { %v1423_v12 = vrot.slane %v331_v7, %v1415_v5 }
  0xe0   :  { %v300_v14 = vpop.xlane.xlu1 %299 }
  0xe1   :  { %v362_v15 = vsub.f32 0.0, %v300_v14 }
  0xe2   :  { %314 = vadd.xlane.f32.xlu0 %v313_v16 }
  0xe3   :  { %v1432_v19 = vrot.slane %v362_v15, %v1403_v58 }
  0xe4   :  { %v258_v22 = vpop.xlane.xlu1 %257 }
  0xe5   :  { %v348_v23 = vsub.f32 0.0, %v258_v22 }
  0xe6   :  { %272 = vadd.xlane.f32.xlu0 %v271_v24 }
  0xe7   :  { %v1441_v28 = vrot.slane %v348_v23, %v1435_v20 }
  0xe8   :  { %v213_v34 = vpop.xlane.xlu1 %212 }
  0xe9   :  { %v333_v35 = vsub.f32 0.0, %v213_v34 }
  0xea   :  { %320 = vadd.xlane.f32.xlu0 %v319_v36 }
  0xeb   :  { %v1448_v37 = vrot.slane %v333_v35, %v1444_v30 }
  0xec   :  { %v306_v40 = vpop.xlane.xlu1 %305 }
  0xed   :  { %v364_v44 = vsub.f32 0.0, %v306_v40 }
  0xef   :  { %v1452_v1 = vrot.slane %v364_v44, %v1435_v20 }
  0xf0   :  { %v264_v46 = vpop.xlane.xlu1 %263 }
  0xf1   :  { %v350_v48 = vsub.f32 0.0, %v264_v46 }
  0xf3   :  { %v1459_v49 = vrot.slane %v350_v48, %v1455_v45 }
  0xf4   :  { %v219_v52 = vpop.xlane.xlu1 %218 }
  0xf5   :  { %v335_v53 = vsub.f32 0.0, %v219_v52 }
  0xf7   :  { %v1465_v54 = vrot.slane %v335_v53, %v1462_v50 }
  0xf8   :  { %v312_v60 = vpop.xlane.xlu1 %311 }
  0xf9   :  { %v366_v61 = vsub.f32 0.0, %v312_v60 }
  0xfb   :  { %v1469_v63 = vrot.slane %v366_v61, %v1455_v45 }
  0xfc   :  { %v270_v6 = vpop.xlane.xlu1 %269 }
  0xfd   :  { %v352_v7 = vsub.f32 0.0, %v270_v6 }
  0xff   :  { %v1476_v8 = vrot.slane %v352_v7, %v1472_v2 }
 0x100   :  { %v225_v10 = vpop.xlane.xlu1 %224  ;;  %435 = vperm.xlu0 %1048, %v1262_v43  }
 0x101   :  { %v337_v13 = vsub.f32 0.0, %v225_v10 }
 0x102   :  { %v421_v17 = vpop.permute.xlu0 %420 }
 0x103   :  { %v1483_v14 = vrot.slane %v337_v13, %v1479_v62  ;;  %vm467_vm6 = vcmp.eq.s32.totalorder %v421_v17, %v1254_v32 }
 0x104   :  { %v318_v15 = vpop.xlane.xlu1 %317  ;;  %441 = vperm.xlu0 %1048, %v1273_v56  }
 0x105   :  { %v368_v16 = vsub.f32 0.0, %v318_v15 }
 0x107   :  { %v1487_v18 = vrot.slane %v368_v16, %v1472_v2 }
 0x108   :  { %v424_v21 = vpop.permute.xlu1 %423  ;;  %447 = vperm.xlu0 %1048, %v1290_v9   ;;  %v1077_v9 = vmov 0.0  }
 0x109   :  { %vm468_vm7 = vcmp.eq.s32.totalorder %v424_v21, %v1254_v32  ;;  %55 = vst [vmem:[#allocation3] sm:$0x7] %v1077_v9  ;;  %1015 = vmatprep.mubr.msk.f32.mxu0 %vm1078_vm12, %v1077_v9 }
 0x10a   :  { %vm1019_vm8 = vmpackc.low %vm468_vm7, %vm467_vm6  ;;  %vm673_vm6 = vcmask 1048512   ;;  %vm833_vm7 = vcmask 1041409  }
 0x10b   :  { %1020 = vmatpush3.bf16.msk.msra.mxu0 %vm1019_vm8, %v1076_v33  ;;  %vm835_vm8 = vcmask 1042434  }
 0x10c   :  { %v427_v43 = vpop.permute.xlu1 %426  ;;  %1021 = vmatprep.subr.bf16.mxu0 %v1075_v29  ;;  %453 = vperm.xlu0 %1048, %v1306_v26  }
 0x10d   :  { %vm469_vm9 = vcmp.eq.s32.totalorder %v427_v43, %v1254_v32 }
 0x110   :  { %v430_v56 = vpop.permute.xlu1 %429  ;;  %462 = vperm.xlu0 %1048, %v1327_v55  }
 0x111   :  { %vm470_vm10 = vcmp.eq.s32.totalorder %v430_v56, %v1254_v32 }
 0x112   :  { %vm1022_vm11 = vmpackc.low %vm470_vm10, %vm469_vm9 }
 0x113   :  { %1023 = vmatpush3.bf16.msk.msra.mxu0 %vm1022_vm11, %v1076_v33 }
 0x114   :  { %1024 = vmatprep.subr.bf16.mxu0 %v1075_v29 }
 0x12f   :  { %v195_v22 = vpop.xlane.xlu0 %194 }
 0x130   :  { %v327_v23 = vsub.f32 0.0, %v195_v22 }
 0x132   :  { %v602_v26 = vrot.slane %v327_v23, %v1363_v25 }
 0x133   :  { %v288_v24 = vpop.xlane.xlu0 %287 }
 0x134   :  { %v604_v27 = vsel %vm603_vm5, %v602_v26, %v1347_v11  ;;  %v358_v34 = vsub.f32 0.0, %v288_v24 }
 0x136   :  { %v776_v55 = vrot.slane %v358_v34, %v1337_v0 }
 0x137   :  { %v198_v35 = vpop.xlane.xlu0 %197 }
 0x138   :  { %v777_v36 = vsel %vm596_vm4, %v776_v55, %v1368_v31  ;;  %v328_v39 = vsub.f32 0.0, %v198_v35  ;;  %vm659_vm4 = vcmask 917312  }
 0x13a   :  { %v609_v40 = vrot.slane %v328_v39, %v1392_v51 }
 0x13b   :  { %v246_v44 = vpop.xlane.xlu0 %245 }
 0x13c   :  { %v611_v41 = vsel %vm610_vm13, %v609_v40, %v604_v27  ;;  %v344_v46 = vsub.f32 0.0, %v246_v44 }
 0x13d   :  { %v618_v48 = vsel %vm617_vm14, %v1388_v47, %v611_v41 }
 0x13e   :  { %v707_v11 = vrot.slane %v344_v46, %v1392_v51 }
 0x13f   :  { %v291_v52 = vpop.xlane.xlu0 %290 }
 0x140   :  { %v708_v0 = vsel %vm610_vm13, %v707_v11, %v1380_v42  ;;  %v359_v53 = vsub.f32 0.0, %v291_v52 }
 0x142   :  { %v781_v59 = vrot.slane %v359_v53, %v1363_v25 }
 0x143   :  { %v249_v31 = vpop.xlane.xlu0 %248 }
 0x144   :  { %v782_v60 = vsel %vm603_vm5, %v781_v59, %v777_v36  ;;  %v345_v61 = vsub.f32 0.0, %v249_v31  ;;  %vm666_vm5 = vcmask 982912  }
 0x145   :  { %v787_v3 = vsel %vm610_vm13, %v1400_v57, %v782_v60  ;;  %v433_v60 = vpop.permute.xlu1 %432 }
 0x146   :  { %v712_v6 = vrot.slane %v345_v61, %v1376_v38  ;;  %vm471_vm9 = vcmp.eq.s32.totalorder %v433_v60, %v1254_v32 }
 0x147   :  { %v204_v7 = vpop.xlane.xlu0 %203 }
 0x148   :  { %v713_v47 = vsel %vm617_vm14, %v712_v6, %v708_v0  ;;  %v330_v10 = vsub.f32 0.0, %v204_v7 }
 0x149   :  { %v718_v51 = vsel %vm624_vm15, %v1412_v4, %v713_v47  ;;  %v439_v47 = vpop.permute.xlu1 %438 }
 0x14a   :  { %v623_v42 = vrot.slane %v330_v10, %v1403_v58  ;;  %vm473_vm12 = vcmp.eq.s32.totalorder %v439_v47, %v1254_v32 }
 0x14b   :  { %v297_v13 = vpop.xlane.xlu0 %296 }
 0x14c   :  { %v625_v25 = vsel %vm624_vm15, %v623_v42, %v618_v48  ;;  %v361_v15 = vsub.f32 0.0, %v297_v13 }
 0x14d   :  { %v632_v16 = vsel %vm631_vm0, %v1423_v12, %v625_v25 }
 0x14e   :  { %v791_v57 = vrot.slane %v361_v15, %v1376_v38 }
 0x14f   :  { %v255_v17 = vpop.xlane.xlu0 %254 }
 0x150   :  { %v792_v21 = vsel %vm617_vm14, %v791_v57, %v787_v3  ;;  %v347_v43 = vsub.f32 0.0, %v255_v17 }
 0x151   :  { %v797_v56 = vsel %vm624_vm15, %v1432_v19, %v792_v21 }
 0x152   :  { %v722_v9 = vrot.slane %v347_v43, %v1415_v5 }
 0x153   :  { %v210_v4 = vpop.xlane.xlu0 %209 }
 0x154   :  { %v723_v58 = vsel %vm631_vm0, %v722_v9, %v718_v51  ;;  %v332_v22 = vsub.f32 0.0, %v210_v4 }
 0x155   :  { %v728_v23 = vsel %vm638_vm1, %v1441_v28, %v723_v58 }
 0x156   :  { %v637_v26 = vrot.slane %v332_v22, %v1435_v20 }
 0x157   :  { %v303_v12 = vpop.xlane.xlu0 %302 }
 0x158   :  { %v639_v38 = vsel %vm638_vm1, %v637_v26, %v632_v16  ;;  %v363_v24 = vsub.f32 0.0, %v303_v12  ;;  %v445_v16 = vpop.permute.xlu1 %444 }
 0x159   :  { %v646_v27 = vsel %vm645_vm2, %v1448_v37, %v639_v38  ;;  %vm475_vm15 = vcmp.eq.s32.totalorder %v445_v16, %v1254_v32 }
 0x15a   :  { %v801_v19 = vrot.slane %v363_v24, %v1415_v5 }
 0x15b   :  { %v261_v34 = vpop.xlane.xlu0 %260 }
 0x15c   :  { %v802_v55 = vsel %vm631_vm0, %v801_v19, %v797_v56  ;;  %v349_v35 = vsub.f32 0.0, %v261_v34  ;;  %v451_v21 = vpop.permute.xlu1 %450 }
 0x15d   :  { %v807_v36 = vsel %vm638_vm1, %v1452_v1, %v802_v55 }
 0x15e   :  { %v732_v39 = vrot.slane %v349_v35, %v1444_v30 }
 0x15f   :  { %v216_v28 = vpop.xlane.xlu0 %215 }
 0x160   :  { %v733_v20 = vsel %vm645_vm2, %v732_v39, %v728_v23  ;;  %v334_v40 = vsub.f32 0.0, %v216_v28  ;;  %v515_v23 = vld [vmem:[#allocation3] sm:$0x7] }
 0x161   :  { %v738_v44 = vsel %vm652_vm3, %v1459_v49, %v733_v20 }
 0x162   :  { %v651_v41 = vrot.slane %v334_v40, %v1455_v45 }
 0x163   :  { %v309_v37 = vpop.xlane.xlu0 %308 }
 0x164   :  { %v653_v5 = vsel %vm652_vm3, %v651_v41, %v646_v27  ;;  %v365_v46 = vsub.f32 0.0, %v309_v37 }
 0x165   :  { %v660_v48 = vsel %vm659_vm4, %v1465_v54, %v653_v5 }
 0x166   :  { %v811_v1 = vrot.slane %v365_v46, %v1444_v30 }
 0x167   :  { %v267_v11 = vpop.xlane.xlu0 %266 }
 0x168   :  { %v812_v52 = vsel %vm645_vm2, %v811_v1, %v807_v36  ;;  %v351_v0 = vsub.f32 0.0, %v267_v11  ;;  %vm477_vm2 = vcmp.eq.s32.totalorder %v451_v21, %v1254_v32 }
 0x169   :  { %v817_v53 = vsel %vm652_vm3, %v1469_v63, %v812_v52 }
 0x16a   :  { %v742_v59 = vrot.slane %v351_v0, %v1462_v50 }
 0x16b   :  { %v222_v49 = vpop.xlane.xlu0 %221 }
 0x16c   :  { %v743_v45 = vsel %vm659_vm4, %v742_v59, %v738_v44  ;;  %v336_v31 = vsub.f32 0.0, %v222_v49 }
 0x16d   :  { %v748_v61 = vsel %vm666_vm5, %v1476_v8, %v743_v45 }
 0x16e   :  { %v665_v54 = vrot.slane %v336_v31, %v1472_v2 }
 0x16f   :  { %v315_v30 = vpop.xlane.xlu0 %314 }
 0x170   :  { %v667_v3 = vsel %vm666_vm5, %v665_v54, %v660_v48  ;;  %v367_v6 = vsub.f32 0.0, %v315_v30 }
 0x171   :  { %v674_v63 = vsel %vm673_vm6, %v1483_v14, %v667_v3 }
 0x172   :  { %v821_v7 = vrot.slane %v367_v6, %v1462_v50 }
 0x173   :  { %v273_v10 = vpop.xlane.xlu0 %272 }
 0x174   :  { %v822_v51 = vsel %vm659_vm4, %v821_v7, %v817_v53  ;;  %v353_v42 = vsub.f32 0.0, %v273_v10 }
 0x175   :  { %v827_v8 = vsel %vm666_vm5, %v1487_v18, %v822_v51 }
 0x176   :  { %v752_v2 = vrot.slane %v353_v42, %v1479_v62 }
 0x177   :  { %v321_v13 = vpop.xlane.xlu0 %320 }
 0x178   :  { %v369_v25 = vsub.f32 0.0, %v321_v13  ;;  %v753_v15 = vsel %vm673_vm6, %v752_v2, %v748_v61 }
 0x179   :  { %v834_v57 = vsel %vm833_vm7, %v753_v15, %v674_v63 }
 0x17a   :  { %v831_v14 = vrot.slane %v369_v25, %v1479_v62  ;;  %v457_v62 = vpop.permute.xlu1 %456 }
 0x17b   :  { %vm479_vm5 = vcmp.eq.s32.totalorder %v457_v62, %v1254_v32 }
 0x17c   :  { %v832_v50 = vsel %vm673_vm6, %v831_v14, %v827_v8 }
 0x17d   :  { %v836_v17 = vsel %vm835_vm8, %v832_v50, %v834_v57 }
 0x17e   :  { %v460_v9 = vpop.permute.xlu1 %459 }
 0x17f   :  { %v436_v43 = vpop.permute.xlu0 %435  ;;  %vm480_vm6 = vcmp.eq.s32.totalorder %v460_v9, %v1254_v32 }
 0x180   :  { %vm472_vm10 = vcmp.eq.s32.totalorder %v436_v43, %v1254_v32  ;;  %vm1037_vm7 = vmpackc.low %vm480_vm6, %vm479_vm5 }
 0x181   :  { %vm1025_vm11 = vmpackc.low %vm472_vm10, %vm471_vm9 }
 0x182   :  { %1026 = vmatpush3.bf16.msk.msra.mxu0 %vm1025_vm11, %v1076_v33  ;;  %v466_v22 = vpop.permute.xlu1 %465 }
 0x183   :  { %v442_v18 = vpop.permute.xlu0 %441  ;;  %1027 = vmatprep.subr.bf16.mxu0 %v1075_v29  ;;  %vm482_vm9 = vcmp.eq.s32.totalorder %v466_v22, %v1254_v32 }
 0x184   :  { %vm474_vm13 = vcmp.eq.s32.totalorder %v442_v18, %v1254_v32 }
 0x185   :  { %vm1028_vm14 = vmpackc.low %vm474_vm13, %vm473_vm12 }
 0x186   :  { %1029 = vmatpush3.bf16.msk.msra.mxu0 %vm1028_vm14, %v1076_v33 }
 0x187   :  { %v448_v56 = vpop.permute.xlu0 %447  ;;  %1030 = vmatprep.subr.bf16.mxu0 %v1075_v29 }
 0x188   :  { %vm476_vm0 = vcmp.eq.s32.totalorder %v448_v56, %v1254_v32 }
 0x189   :  { %vm1031_vm1 = vmpackc.low %vm476_vm0, %vm475_vm15 }
 0x18a   :  { %1032 = vmatpush3.bf16.msk.msra.mxu0 %vm1031_vm1, %v1076_v33 }
 0x18b   :  { %v454_v4 = vpop.permute.xlu0 %453  ;;  %1033 = vmatprep.subr.bf16.mxu0 %v1075_v29 }
 0x18c   :  { %vm478_vm3 = vcmp.eq.s32.totalorder %v454_v4, %v1254_v32 }
 0x18d   :  { %vm1034_vm4 = vmpackc.low %vm478_vm3, %vm477_vm2 }
 0x18e   :  { %1035 = vmatpush3.bf16.msk.msra.mxu0 %vm1034_vm4, %v1076_v33 }
 0x18f   :  { %v463_v58 = vpop.permute.xlu0 %462  ;;  %1036 = vmatprep.subr.bf16.mxu0 %v1075_v29 }
 0x190   :  { %vm481_vm8 = vcmp.eq.s32.totalorder %v463_v58, %v1254_v32 }
 0x191   :  { %vm1040_vm10 = vmpackc.low %vm482_vm9, %vm481_vm8 }
 0x192   :  { %1038 = vmatpush3.bf16.msk.msra.mxu0 %vm1037_vm7, %v1076_v33 }
 0x193   :  { %1039 = vmatprep.subr.bf16.mxu0 %v1075_v29 }
 0x196   :  { %1041 = vmatpush3.bf16.msk.msra.mxu0 %vm1040_vm10, %v1076_v33 }
 0x199   :  { %1016 = vmatmul.mubr.f32.vlgmr.msra.gmra.mrb[0].mxu0 %v836_v17 }
 0x26c   :  { %v904_v26 = vpop.f32.mrb[0].mxu0 }
 0x26d   :  { %v908_v12 = vadd.f32 %v904_v26, %v515_v23  ;;  %v1017_v38 = vpop.f32.mrb[1].mxu0 }
 0x26f   :  { %909 = vst [vmem:[#allocation3] sm:$0x7] %v908_v12 }
 0x270   :  { %1061 = shalt.err (!%p1058_p4)
}
 0x271   :  { %s1062_s27 = scalar_lea.hbm %s1595_s3, 64 }
 0x272   :  { %p1063_p5 = scmp.ne.s32.totalorder %s1595_s3, %s1062_s27  ;;  %p1066_p6 = scmp.lt.u32.totalorder %s1062_s27, %s1595_s3 }
 0x274   :  { %p1068_p7 = pnand %p1066_p6, %p1063_p5 }
 0x276   :  { %1071 = shalt.err (!%p1068_p7)
}
 0x277   :  { %919 = dma.vmem_to_hbm [thread:$0]  %s917_s23, 64, %s1595_s3, [#allocation4]  }
 0x278   :  { %1072 = dma.done.wait [#allocation4], 64  }
 0x279   :  { %1073 = vsyncadd [#allocation4], 4294967232 }
 0x27a   :  { %923 = vsyncpa [#allocation4], 1 }

// kernel: tpu_custom_call.1
= control target key start
LH: loop header
LB: loop body
LE: loop exit
PB: predicated region body
PF: predicated region fallthrough
CT: control target
= control target key end

     0   :  { %vm185_vm0 = vcmask 261120   ;;  %v1068_v3 = vmov 0   ;;  %s1719_s0 = inlined_call_operand.vmem [shape: f32[3,128,32], index: 0, kind: input, shape index: {}]   ;;  %s1720_s1 = inlined_call_operand.vmem [shape: s32[128,1], index: 1, kind: input, shape index: {}]   ;;  %s1721_s2 = inlined_call_operand.vmem [shape: f32[1,32], index: 2, kind: input, shape index: {}]   ;;  %s1722_s3 = inlined_call_operand.hbm [shape: f32[3,128], index: 3, kind: output, shape index: {}]  }
   0x1   :  { %v378_v0 = vld [vmem:[%s1720_s1] sm:$0xff]  ;;  %v84_v2 = vld [vmem:[%s1719_s0 + $0x8] sm:$0xff]  ;;  %1042 = vset.pattern.permute.xlu0 %v1068_v3  ;;  %v85_v5 = vld [vmem:[%s1719_s0 + $0x10] sm:$0xff]  ;;  %1043 = vset.pattern.permute.xlu1 %v1068_v3 }
   0x2   :  { %v1100_v1 = vld [vmem:[%s1721_s2] ss:$0 sm:$0xff]  ;;  %411 = vperm.xlu0 %1042, %v378_v0   ;;  %v379_v9 = vld [vmem:[%s1720_s1 + $0x8] sm:$0xff]  ;;  %v86_v12 = vld [vmem:[%s1719_s0 + $0x18] sm:$0xff] }
   0x3   :  { %v138_v4 = vmul.f32 %v1100_v1, %v84_v2  ;;  %v139_v6 = vmul.f32 %v1100_v1, %v85_v5  ;;  %v115_v7 = vld [vmem:[%s1719_s0 + $0x100] sm:$0xff]  ;;  %v117_v13 = vld [vmem:[%s1719_s0 + $0x110] sm:$0xff]  ;;  %v88_v15 = vld [vmem:[%s1719_s0 + $0x28] sm:$0xff]  ;;  %v140_v17 = vmul.f32 %v1100_v1, %v86_v12 }
   0x4   :  { %v169_v11 = vmul.f32 %v1100_v1, %v115_v7  ;;  %v103_v14 = vld [vmem:[%s1719_s0 + $0xa0] sm:$0xff]  ;;  %v171_v18 = vmul.f32 %v1100_v1, %v117_v13  ;;  %v142_v20 = vmul.f32 %v1100_v1, %v88_v15  ;;  %v125_v22 = vld [vmem:[%s1719_s0 + $0x150] sm:$0xff]  ;;  %v104_v23 = vld [vmem:[%s1719_s0 + $0xa8] sm:$0xff] }
   0x5   :  { %v189_v8 = vsel %vm185_vm0, %v138_v4, 0.0  ;;  %v192_v10 = vsel %vm185_vm0, %v139_v6, 0.0  ;;  %v157_v19 = vmul.f32 %v1100_v1, %v103_v14  ;;  %v119_v21 = vld [vmem:[%s1719_s0 + $0x120] sm:$0xff]  ;;  %v89_v25 = vld [vmem:[%s1719_s0 + $0x30] sm:$0xff]  ;;  %v96_v26 = vld [vmem:[%s1719_s0 + $0x68] sm:$0xff]  ;;  %v195_v28 = vsel %vm185_vm0, %v140_v17, 0.0 }
   0x6   :  { %190 = vadd.xlane.f32.xlu1 %v189_v8  ;;  %414 = vperm.xlu0 %1042, %v379_v9   ;;  %v282_v16 = vsel %vm185_vm0, %v169_v11, 0.0  ;;  %v111_v24 = vld [vmem:[%s1719_s0 + $0xe0] sm:$0xff]  ;;  %v120_v27 = vld [vmem:[%s1719_s0 + $0x128] sm:$0xff]  ;;  %v288_v29 = vsel %vm185_vm0, %v171_v18, 0.0  ;;  %v1160_v30 = vmul.f32 %v1100_v1, %v119_v21  ;;  %v179_v31 = vmul.f32 %v1100_v1, %v125_v22  ;;  %v106_v33 = vld [vmem:[%s1719_s0 + $0xb8] sm:$0xff] }
   0x7   :  { %v127_v32 = vld [vmem:[%s1719_s0 + $0x160] sm:$0xff]  ;;  %v246_v34 = vsel %vm185_vm0, %v157_v19, 0.0  ;;  %v1171_v35 = vsel %vm185_vm0, %v142_v20, 0.0  ;;  %v158_v36 = vmul.f32 %v1100_v1, %v104_v23  ;;  %v165_v37 = vmul.f32 %v1100_v1, %v111_v24  ;;  %v113_v38 = vld [vmem:[%s1719_s0 + $0xf0] sm:$0xff]  ;;  %v98_v44 = vld [vmem:[%s1719_s0 + $0x78] sm:$0xff] }
   0x8   :  { %v1179_v39 = vsel %vm185_vm0, %v179_v31, 0.0  ;;  %v143_v40 = vmul.f32 %v1100_v1, %v89_v25  ;;  %v150_v41 = vmul.f32 %v1100_v1, %v96_v26  ;;  %v174_v42 = vmul.f32 %v1100_v1, %v120_v27  ;;  %v91_v43 = vld [vmem:[%s1719_s0 + $0x40] sm:$0xff]  ;;  %v122_v49 = vld [vmem:[%s1719_s0 + $0x138] sm:$0xff]  ;;  %v129_v50 = vld [vmem:[%s1719_s0 + $0x170] sm:$0xff] }
   0x9   :  { %v1191_v45 = vsel %vm185_vm0, %v158_v36, 0.0  ;;  %v1194_v46 = vsel %vm185_vm0, %v165_v37, 0.0  ;;  %v181_v47 = vmul.f32 %v1100_v1, %v127_v32  ;;  %v160_v48 = vmul.f32 %v1100_v1, %v106_v33  ;;  %v108_v51 = vld [vmem:[%s1719_s0 + $0xc8] sm:$0xff]  ;;  %v93_v56 = vld [vmem:[%s1719_s0 + $0x50] sm:$0xff]  ;;  %v110_v62 = vld [vmem:[%s1719_s0 + $0xd8] sm:$0xff] }
   0xa   :  { %193 = vadd.xlane.f32.xlu1 %v192_v10  ;;  %v1208_v52 = vsel %vm185_vm0, %v143_v40, 0.0  ;;  %v1211_v53 = vsel %vm185_vm0, %v150_v41, 0.0  ;;  %v1214_v54 = vsel %vm185_vm0, %v174_v42, 0.0  ;;  %v167_v55 = vmul.f32 %v1100_v1, %v113_v38  ;;  %v124_v57 = vld [vmem:[%s1719_s0 + $0x148] sm:$0xff]  ;;  %v95_v4 = vld [vmem:[%s1719_s0 + $0x60] sm:$0xff]  ;;  %v126_v5 = vld [vmem:[%s1719_s0 + $0x158] sm:$0xff] }
   0xb   :  { %v1224_v58 = vsel %vm185_vm0, %v181_v47, 0.0  ;;  %v1227_v59 = vsel %vm185_vm0, %v160_v48, 0.0  ;;  %v145_v60 = vmul.f32 %v1100_v1, %v91_v43  ;;  %v152_v61 = vmul.f32 %v1100_v1, %v98_v44  ;;  %v112_v6 = vld [vmem:[%s1719_s0 + $0xe8] sm:$0xff]  ;;  %v97_v11 = vld [vmem:[%s1719_s0 + $0x70] sm:$0xff] }
   0xc   :  { %v1235_v63 = vsel %vm185_vm0, %v167_v55, 0.0  ;;  %v176_v0 = vmul.f32 %v1100_v1, %v122_v49  ;;  %v183_v2 = vmul.f32 %v1100_v1, %v129_v50  ;;  %v162_v3 = vmul.f32 %v1100_v1, %v108_v51  ;;  %v128_v12 = vld [vmem:[%s1719_s0 + $0x168] sm:$0xff] }
   0xd   :  { %v1250_v7 = vsel %vm185_vm0, %v145_v60, 0.0  ;;  %v1253_v8 = vsel %vm185_vm0, %v152_v61, 0.0  ;;  %v147_v9 = vmul.f32 %v1100_v1, %v93_v56  ;;  %v178_v10 = vmul.f32 %v1100_v1, %v124_v57 }
   0xe   :  { %283 = vadd.xlane.f32.xlu1 %v282_v16 }
  0x12   :  { %196 = vadd.xlane.f32.xlu1 %v195_v28 }
  0x16   :  { %289 = vadd.xlane.f32.xlu1 %v288_v29 }
  0x17   :  { %8 = vsyncpa [#allocation4], 0  ;;  %v1264_v13 = vsel %vm185_vm0, %v176_v0, 0.0  ;;  %v1267_v14 = vsel %vm185_vm0, %v183_v2, 0.0  ;;  %v1270_v15 = vsel %vm185_vm0, %v162_v3, 0.0  ;;  %v164_v16 = vmul.f32 %v1100_v1, %v110_v62  ;;  %v114_v17 = vld [vmem:[%s1719_s0 + $0xf8] sm:$0xff] }
  0x18   :  { %v130_v18 = vld [vmem:[%s1719_s0 + $0x178] sm:$0xff]  ;;  %v1280_v19 = vsel %vm185_vm0, %v147_v9, 0.0  ;;  %v1283_v20 = vsel %vm185_vm0, %v178_v10, 0.0  ;;  %v149_v21 = vmul.f32 %v1100_v1, %v95_v4  ;;  %v180_v22 = vmul.f32 %v1100_v1, %v126_v5  ;;  %v83_v41 = vld [vmem:[%s1719_s0] sm:$0xff]  ;;  %v121_v51 = vld [vmem:[%s1719_s0 + $0x130] sm:$0xff] }
  0x19   :  { %v1288_v23 = vsel %vm185_vm0, %v164_v16, 0.0  ;;  %v166_v24 = vmul.f32 %v1100_v1, %v112_v6  ;;  %v151_v25 = vmul.f32 %v1100_v1, %v97_v11  ;;  %v182_v26 = vmul.f32 %v1100_v1, %v128_v12  ;;  %v90_v47 = vld [vmem:[%s1719_s0 + $0x38] sm:$0xff]  ;;  %v99_v48 = vld [vmem:[%s1719_s0 + $0x80] sm:$0xff]  ;;  %v100_v55 = vld [vmem:[%s1719_s0 + $0x88] sm:$0xff] }
  0x1a   :  { %247 = vadd.xlane.f32.xlu1 %v246_v34  ;;  %v1294_v27 = vsel %vm185_vm0, %v149_v21, 0.0  ;;  %v1297_v28 = vsel %vm185_vm0, %v180_v22, 0.0  ;;  %v168_v29 = vmul.f32 %v1100_v1, %v114_v17  ;;  %v184_v31 = vmul.f32 %v1100_v1, %v130_v18  ;;  %v105_v34 = vld [vmem:[%s1719_s0 + $0xb0] sm:$0xff]  ;;  %v107_v62 = vld [vmem:[%s1719_s0 + $0xc0] sm:$0xff]  ;;  %v92_v6 = vld [vmem:[%s1719_s0 + $0x48] sm:$0xff] }
  0x1b   :  { %v1302_v32 = vsel %vm185_vm0, %v166_v24, 0.0  ;;  %v1305_v33 = vsel %vm185_vm0, %v151_v25, 0.0  ;;  %v1308_v36 = vsel %vm185_vm0, %v182_v26, 0.0  ;;  %v1069_v40 = vmov 0.0|0.0   ;;  %v101_v0 = vld [vmem:[%s1719_s0 + $0x90] sm:$0xff]  ;;  %v116_v9 = vld [vmem:[%s1719_s0 + $0x108] sm:$0xff] }
  0x1c   :  { %v1314_v37 = vsel %vm185_vm0, %v168_v29, 0.0  ;;  %v1317_v38 = vsel %vm185_vm0, %v184_v31, 0.0  ;;  %1012 = vmatprep.subr.bf16.mxu0 %v1069_v40  ;;  %v294_v42 = vsel %vm185_vm0, %v1160_v30, 0.0  ;;  %v159_v43 = vmul.f32 %v1100_v1, %v105_v34  ;;  %v123_v17 = vld [vmem:[%s1719_s0 + $0x140] sm:$0xff]  ;;  %v102_v18 = vld [vmem:[%s1719_s0 + $0x98] sm:$0xff]  ;;  %v109_v26 = vld [vmem:[%s1719_s0 + $0xd0] sm:$0xff] }
  0x1d   :  { %v137_v44 = vmul.f32 %v1100_v1, %v83_v41  ;;  %v153_v30 = vmul.f32 %v1100_v1, %v99_v48  ;;  %v175_v57 = vmul.f32 %v1100_v1, %v121_v51  ;;  %v154_v61 = vmul.f32 %v1100_v1, %v100_v55  ;;  %v87_v29 = vld [vmem:[%s1719_s0 + $0x20] sm:$0xff]  ;;  %v383_v51 = vld [vmem:[%s1720_s1 + $0x28] sm:$0xff] }
  0x1e   :  { %202 = vadd.xlane.f32.xlu1 %v1171_v35  ;;  %v252_v49 = vsel %vm185_vm0, %v159_v43, 0.0  ;;  %v144_v35 = vmul.f32 %v1100_v1, %v90_v47  ;;  %v161_v3 = vmul.f32 %v1100_v1, %v107_v62  ;;  %v155_v5 = vmul.f32 %v1100_v1, %v101_v0  ;;  %v94_v43 = vld [vmem:[%s1719_s0 + $0x58] sm:$0xff] }
  0x1f   :  { %v186_v50 = vsel %vm185_vm0, %v137_v44, 0.0  ;;  %v234_v60 = vsel %vm185_vm0, %v153_v30, 0.0  ;;  %v300_v2 = vsel %vm185_vm0, %v175_v57, 0.0  ;;  %v237_v4 = vsel %vm185_vm0, %v154_v61, 0.0  ;;  %v118_v44 = vld [vmem:[%s1719_s0 + $0x118] sm:$0xff] }
  0x20   :  { %v207_v56 = vsel %vm185_vm0, %v144_v35, 0.0  ;;  %v258_v10 = vsel %vm185_vm0, %v161_v3, 0.0  ;;  %v146_v11 = vmul.f32 %v1100_v1, %v92_v6  ;;  %v240_v12 = vsel %vm185_vm0, %v155_v5, 0.0  ;;  %v385_v0 = vld [vmem:[%s1720_s1 + $0x38] sm:$0xff]  ;;  %v387_v5 = vld [vmem:[%s1720_s1 + $0x48] sm:$0xff] }
  0x21   :  { %v170_v16 = vmul.f32 %v1100_v1, %v116_v9  ;;  %v177_v22 = vmul.f32 %v1100_v1, %v123_v17  ;;  %v156_v25 = vmul.f32 %v1100_v1, %v102_v18  ;;  %v163_v34 = vmul.f32 %v1100_v1, %v109_v26 }
  0x22   :  { %295 = vadd.xlane.f32.xlu1 %v294_v42  ;;  %v213_v21 = vsel %vm185_vm0, %v146_v11, 0.0  ;;  %v141_v42 = vmul.f32 %v1100_v1, %v87_v29  ;;  %v148_v48 = vmul.f32 %v1100_v1, %v94_v43  ;;  %v172_v35 = vmul.f32 %v1100_v1, %v118_v44  ;;  %v380_v1 = vld [vmem:[%s1720_s1 + $0x10] sm:$0xff] }
  0x23   :  { %v285_v24 = vsel %vm185_vm0, %v170_v16, 0.0  ;;  %v306_v31 = vsel %vm185_vm0, %v177_v22, 0.0  ;;  %v243_v41 = vsel %vm185_vm0, %v156_v25, 0.0  ;;  %v264_v47 = vsel %vm185_vm0, %v163_v34, 0.0  ;;  %v389_v16 = vld [vmem:[%s1720_s1 + $0x58] sm:$0xff]  ;;  %v392_v25 = vld [vmem:[%s1720_s1 + $0x70] sm:$0xff] }
  0x24   :  { %v291_v30 = vsel %vm185_vm0, %v172_v35, 0.0  ;;  %vm1072_vm4 = vmmov 0   ;;  %vm566_vm5 = vcmask 130112   ;;  %vm573_vm6 = vcmask 195712  }
  0x25   :  { %187 = vadd.xlane.f32.xlu0 %v186_v50  ;;  %v219_v50 = vsel %vm185_vm0, %v148_v48, 0.0  ;;  %vm580_vm7 = vcmask 261312   ;;  %vm587_vm8 = vcmask 326912   ;;  %vm594_vm9 = vcmask 392512  }
  0x26   :  { %253 = vadd.xlane.f32.xlu1 %v252_v49  ;;  %v198_v49 = vsel %vm185_vm0, %v141_v42, 0.0  ;;  %vm601_vm10 = vcmask 458112   ;;  %vm608_vm11 = vcmask 523712   ;;  %vm615_vm12 = vcmask 589312  }
  0x27   :  { %vm622_vm13 = vcmask 654912   ;;  %vm629_vm14 = vcmask 720512   ;;  %vm636_vm0 = vcmask 786112  }
  0x29   :  { %235 = vadd.xlane.f32.xlu0 %v234_v60 }
  0x2a   :  { %208 = vadd.xlane.f32.xlu1 %v207_v56 }
  0x2d   :  { %238 = vadd.xlane.f32.xlu0 %v237_v4 }
  0x2e   :  { %301 = vadd.xlane.f32.xlu1 %v300_v2 }
  0x31   :  { %241 = vadd.xlane.f32.xlu0 %v240_v12 }
  0x32   :  { %259 = vadd.xlane.f32.xlu1 %v258_v10 }
  0x35   :  { %286 = vadd.xlane.f32.xlu0 %v285_v24 }
  0x36   :  { %214 = vadd.xlane.f32.xlu1 %v213_v21 }
  0x39   :  { %244 = vadd.xlane.f32.xlu0 %v243_v41 }
  0x3a   :  { %307 = vadd.xlane.f32.xlu1 %v306_v31 }
  0x3d   :  { %199 = vadd.xlane.f32.xlu0 %v198_v49 }
  0x3e   :  { %265 = vadd.xlane.f32.xlu1 %v264_v47 }
  0x41   :  { %292 = vadd.xlane.f32.xlu0 %v291_v30 }
  0x42   :  { %220 = vadd.xlane.f32.xlu1 %v219_v50  ;;  %v1071_v50 = vmov 0.0  }
  0x43   :  { %63 = vst [vmem:[#allocation3] sm:$0x7] %v1071_v50  ;;  %1009 = vmatprep.mubr.msk.f32.mxu0 %vm1072_vm4, %v1071_v50  ;;  %vm650_vm4 = vcmask 917312  }
  0x45   :  { %250 = vadd.xlane.f32.xlu0 %v1191_v45  ;;  %v382_v45 = vld [vmem:[%s1720_s1 + $0x20] sm:$0xff] }
  0x46   :  { %313 = vadd.xlane.f32.xlu1 %v1179_v39  ;;  %v381_v39 = vld [vmem:[%s1720_s1 + $0x18] sm:$0xff] }
  0x49   :  { %205 = vadd.xlane.f32.xlu0 %v1208_v52  ;;  %v386_v52 = vld [vmem:[%s1720_s1 + $0x40] sm:$0xff] }
  0x4a   :  { %271 = vadd.xlane.f32.xlu1 %v1194_v46  ;;  %v384_v46 = vld [vmem:[%s1720_s1 + $0x30] sm:$0xff] }
  0x4d   :  { %298 = vadd.xlane.f32.xlu0 %v1214_v54  ;;  %v388_v54 = vld [vmem:[%s1720_s1 + $0x50] sm:$0xff] }
  0x4e   :  { %226 = vadd.xlane.f32.xlu1 %v1211_v53  ;;  %v64_v53 = vlaneseq }
  0x51   :  { %256 = vadd.xlane.f32.xlu0 %v1227_v59  ;;  %v1441_v59 = vand.u32 127, %v64_v53 }
  0x52   :  { %319 = vadd.xlane.f32.xlu1 %v1224_v58 }
  0x53   :  { %v575_v55 = vadd.s32 4294967272, %v1441_v59  ;;  %v582_v6 = vadd.s32 4294967264, %v1441_v59  ;;  %v589_v17 = vadd.s32 4294967256, %v1441_v59  ;;  %v596_v34 = vadd.s32 4294967248, %v1441_v59 }
  0x54   :  { %v603_v47 = vadd.s32 4294967240, %v1441_v59 }
  0x55   :  { %211 = vadd.xlane.f32.xlu0 %v1250_v7 }
  0x56   :  { %277 = vadd.xlane.f32.xlu1 %v1235_v63  ;;  %v390_v63 = vld [vmem:[%s1720_s1 + $0x60] sm:$0xff] }
  0x59   :  { %304 = vadd.xlane.f32.xlu0 %v1264_v13  ;;  %v1070_v13 = vmov 1.0|1.0  }
  0x5a   :  { %232 = vadd.xlane.f32.xlu1 %v1253_v8  ;;  %v391_v8 = vld [vmem:[%s1720_s1 + $0x68] sm:$0xff] }
  0x5d   :  { %262 = vadd.xlane.f32.xlu0 %v1270_v15  ;;  %v1457_v15 = vshrl.u32 %v64_v53, 7 }
  0x5e   :  { %325 = vadd.xlane.f32.xlu1 %v1267_v14  ;;  %v393_v14 = vld [vmem:[%s1720_s1 + $0x78] sm:$0xff]  ;;  %s1073_s1 = smov [#allocation3]  }
  0x5f   :  { %v559_v60 = vsub.s32 %v1441_v59, %v1457_v15  ;;  %v1478_v62 = vsub.s32 %v575_v55, %v1457_v15  ;;  %v1492_v12 = vsub.s32 %v582_v6, %v1457_v15  ;;  %v1502_v24 = vsub.s32 %v589_v17, %v1457_v15  ;;  %s907_s28 = sshll.u32 %s1073_s1, 4  ;;  %s908_s28 = int_to_ptr.vmem [resolvable:$true] %s907_s28 }
  0x60   :  { %v1515_v44 = vsub.s32 %v596_v34, %v1457_v15  ;;  %s1044_s0 = scalar_lea.vmem %s908_s28, 64  ;;  %p1049_p1 = scmp.lt.s32.totalorder %s908_s28, %s908_s28 }
  0x61   :  { %217 = vadd.xlane.f32.xlu0 %v1280_v19  ;;  %v561_v19 = vadd.s32 4294967288, %v1441_v59  ;;  %p1045_p0 = scmp.ne.s32.totalorder %s908_s28, %s1044_s0  ;;  %p1050_p2 = scmp.lt.s32.totalorder %s1044_s0, %s1044_s0 }
  0x63   :  { %p1051_p3 = por %p1050_p2, %p1049_p1 }
  0x65   :  { %310 = vadd.xlane.f32.xlu0 %v1283_v20  ;;  %v1461_v20 = vsub.s32 %v561_v19, %v1457_v15  ;;  %p1052_p4 = pnand %p1051_p3, %p1045_p0 }
  0x69   :  { %268 = vadd.xlane.f32.xlu0 %v1288_v23  ;;  %v568_v23 = vadd.s32 4294967280, %v1441_v59 }
  0x6d   :  { %223 = vadd.xlane.f32.xlu0 %v1294_v27 }
  0x6f   :  { %417 = vperm.xlu1 %1043, %v380_v1  }
  0x71   :  { %316 = vadd.xlane.f32.xlu0 %v1297_v28 }
  0x73   :  { %420 = vperm.xlu1 %1043, %v381_v39   ;;  %v1522_v39 = vsub.s32 %v603_v47, %v1457_v15  ;;  %v631_v47 = vadd.s32 4294967208, %v1441_v59 }
  0x75   :  { %274 = vadd.xlane.f32.xlu0 %v1302_v32 }
  0x77   :  { %423 = vperm.xlu1 %1043, %v382_v45  }
  0x79   :  { %229 = vadd.xlane.f32.xlu0 %v1305_v33  ;;  %v1466_v33 = vsub.s32 %v568_v23, %v1457_v15 }
  0x7b   :  { %429 = vperm.xlu1 %1043, %v384_v46  }
  0x7d   :  { %322 = vadd.xlane.f32.xlu0 %v1308_v36 }
  0x7f   :  { %435 = vperm.xlu1 %1043, %v386_v52  }
  0x81   :  { %v412_v58 = vpop.permute.xlu0 %411  ;;  %280 = vadd.xlane.f32.xlu0 %v1314_v37 }
  0x82   :  { %vm458_vm1 = vcmp.eq.s32.totalorder %v412_v58, %v1441_v59 }
  0x83   :  { %441 = vperm.xlu1 %1043, %v388_v54  }
  0x85   :  { %v415_v7 = vpop.permute.xlu0 %414  ;;  %328 = vadd.xlane.f32.xlu0 %v1317_v38 }
  0x86   :  { %vm459_vm2 = vcmp.eq.s32.totalorder %v415_v7, %v1441_v59 }
  0x87   :  { %447 = vperm.xlu1 %1043, %v390_v63   ;;  %vm1013_vm3 = vmpackc.low %vm459_vm2, %vm458_vm1 }
  0x88   :  { %1014 = vmatpush3.bf16.msk.msra.mxu0 %vm1013_vm3, %v1070_v13  ;;  %vm643_vm3 = vcmask 851712  }
  0x89   :  { %1015 = vmatprep.subr.bf16.mxu0 %v1069_v40 }
  0x8b   :  { %450 = vperm.xlu1 %1043, %v391_v8   ;;  %v610_v8 = vadd.s32 4294967232, %v1441_v59 }
  0x8f   :  { %456 = vperm.xlu1 %1043, %v393_v14  }
  0x93   :  { %v191_v27 = vpop.xlane.xlu1 %190 }
  0x94   :  { %v331_v28 = vsub.f32 0.0, %v191_v27 }
  0x96   :  { %v565_v32 = vrot.slane %v331_v28, %v1461_v20 }
  0x97   :  { %v194_v36 = vpop.xlane.xlu1 %193 }
  0x98   :  { %v332_v37 = vsub.f32 0.0, %v194_v36 }
  0x9a   :  { %v572_v38 = vrot.slane %v332_v37, %v1466_v33 }
  0x9b   :  { %v284_v56 = vpop.xlane.xlu1 %283  ;;  %426 = vperm.xlu0 %1042, %v383_v51  }
  0x9c   :  { %v362_v57 = vsub.f32 0.0, %v284_v56 }
  0x9e   :  { %v1475_v61 = vrot.slane %v362_v57, %v559_v60 }
  0x9f   :  { %v197_v2 = vpop.xlane.xlu1 %196  ;;  %432 = vperm.xlu0 %1042, %v385_v0  }
  0xa0   :  { %v333_v3 = vsub.f32 0.0, %v197_v2 }
  0xa2   :  { %v579_v4 = vrot.slane %v333_v3, %v1478_v62 }
  0xa3   :  { %v290_v9 = vpop.xlane.xlu1 %289  ;;  %438 = vperm.xlu0 %1042, %v387_v5  }
  0xa4   :  { %v364_v10 = vsub.f32 0.0, %v290_v9 }
  0xa6   :  { %v1489_v11 = vrot.slane %v364_v10, %v1466_v33 }
  0xa7   :  { %v248_v18 = vpop.xlane.xlu1 %247  ;;  %444 = vperm.xlu0 %1042, %v389_v16  }
  0xa8   :  { %v350_v21 = vsub.f32 0.0, %v248_v18  ;;  %v624_v18 = vadd.s32 4294967216, %v1441_v59 }
  0xaa   :  { %v1499_v22 = vrot.slane %v350_v21, %v1492_v12 }
  0xab   :  { %v203_v26 = vpop.xlane.xlu1 %202  ;;  %453 = vperm.xlu0 %1042, %v392_v25  }
  0xac   :  { %v335_v29 = vsub.f32 0.0, %v203_v26 }
  0xae   :  { %v1508_v31 = vrot.slane %v335_v29, %v1502_v24 }
  0xaf   :  { %v296_v41 = vpop.xlane.xlu1 %295 }
  0xb0   :  { %v366_v42 = vsub.f32 0.0, %v296_v41 }
  0xb2   :  { %v1512_v43 = vrot.slane %v366_v42, %v1492_v12  ;;  %v188_v35 = vpop.xlane.xlu0 %187  ;;  %v1559_v42 = vsub.s32 %v624_v18, %v1457_v15 }
  0xb3   :  { %v254_v48 = vpop.xlane.xlu1 %253  ;;  %v330_v30 = vsub.f32 0.0, %v188_v35 }
  0xb4   :  { %v352_v49 = vsub.f32 0.0, %v254_v48 }
  0xb5   :  { %v560_v45 = vrot.slane %v330_v30, %v559_v60 }
  0xb6   :  { %v1519_v1 = vrot.slane %v352_v49, %v1515_v44  ;;  %v236_v53 = vpop.xlane.xlu0 %235 }
  0xb7   :  { %v209_v46 = vpop.xlane.xlu1 %208  ;;  %v567_v54 = vsel %vm566_vm5, %v565_v32, %v560_v45  ;;  %v346_v58 = vsub.f32 0.0, %v236_v53  ;;  %v1535_v32 = vsub.s32 %v610_v8, %v1457_v15 }
  0xb8   :  { %v337_v52 = vsub.f32 0.0, %v209_v46  ;;  %v574_v63 = vsel %vm573_vm6, %v572_v38, %v567_v54  ;;  %v617_v38 = vadd.s32 4294967224, %v1441_v59  ;;  %v1570_v46 = vsub.s32 %v631_v47, %v1457_v15 }
  0xb9   :  { %v669_v14 = vrot.slane %v346_v58, %v559_v60  ;;  %v581_v23 = vsel %vm580_vm7, %v579_v4, %v574_v63 }
  0xba   :  { %v1527_v7 = vrot.slane %v337_v52, %v1522_v39  ;;  %v239_v28 = vpop.xlane.xlu0 %238  ;;  %v1544_v3 = vsub.s32 %v617_v38, %v1457_v15 }
  0xbb   :  { %v302_v19 = vpop.xlane.xlu1 %301  ;;  %v347_v36 = vsub.f32 0.0, %v239_v28 }
  0xbc   :  { %v368_v27 = vsub.f32 0.0, %v302_v19  ;;  %v638_v19 = vadd.s32 4294967200, %v1441_v59 }
  0xbd   :  { %v673_v51 = vrot.slane %v347_v36, %v1461_v20 }
  0xbe   :  { %v1532_v37 = vrot.slane %v368_v27, %v1515_v44  ;;  %v242_v57 = vpop.xlane.xlu0 %241 }
  0xbf   :  { %v260_v55 = vpop.xlane.xlu1 %259  ;;  %v674_v60 = vsel %vm566_vm5, %v673_v51, %v669_v14  ;;  %v348_v0 = vsub.f32 0.0, %v242_v57 }
  0xc0   :  { %v354_v56 = vsub.f32 0.0, %v260_v55 }
  0xc1   :  { %v678_v4 = vrot.slane %v348_v0, %v1466_v33 }
  0xc2   :  { %v1541_v2 = vrot.slane %v354_v56, %v1535_v32  ;;  %v287_v9 = vpop.xlane.xlu0 %286  ;;  %v645_v56 = vadd.s32 4294967192, %v1441_v59 }
  0xc3   :  { %v215_v5 = vpop.xlane.xlu1 %214  ;;  %v679_v10 = vsel %vm573_vm6, %v678_v4, %v674_v60  ;;  %v363_v16 = vsub.f32 0.0, %v287_v9 }
  0xc4   :  { %v339_v6 = vsub.f32 0.0, %v215_v5  ;;  %v1599_v9 = vsub.s32 %v645_v56, %v1457_v15 }
  0xc5   :  { %v752_v21 = vrot.slane %v363_v16, %v1461_v20 }
  0xc6   :  { %v1549_v17 = vrot.slane %v339_v6, %v1544_v3  ;;  %v245_v29 = vpop.xlane.xlu0 %244 }
  0xc7   :  { %v308_v25 = vpop.xlane.xlu1 %307  ;;  %v753_v34 = vsel %vm566_vm5, %v752_v21, %v1475_v61  ;;  %v349_v33 = vsub.f32 0.0, %v245_v29  ;;  %vm657_vm5 = vcmask 982912  }
  0xc8   :  { %v370_v26 = vsub.f32 0.0, %v308_v25  ;;  %v758_v48 = vsel %vm573_vm6, %v1489_v11, %v753_v34  ;;  %v652_v34 = vadd.s32 4294967184, %v1441_v59  ;;  %vm664_vm6 = vcmask 1048512  }
  0xc9   :  { %v683_v20 = vrot.slane %v349_v33, %v1478_v62 }
  0xca   :  { %v1556_v41 = vrot.slane %v370_v26, %v1535_v32  ;;  %v200_v50 = vpop.xlane.xlu0 %199 }
  0xcb   :  { %v266_v49 = vpop.xlane.xlu1 %265  ;;  %v684_v61 = vsel %vm580_vm7, %v683_v20, %v679_v10  ;;  %v334_v30 = vsub.f32 0.0, %v200_v50  ;;  %v1617_v50 = vsub.s32 %v652_v34, %v1457_v15 }
  0xcc   :  { %v356_v35 = vsub.f32 0.0, %v266_v49  ;;  %v689_v52 = vsel %vm587_vm8, %v1499_v22, %v684_v61  ;;  %v659_v61 = vadd.s32 4294967176, %v1441_v59 }
  0xcd   :  { %v586_v11 = vrot.slane %v334_v30, %v1492_v12 }
  0xce   :  { %v1567_v45 = vrot.slane %v356_v35, %v1559_v42  ;;  %v293_v58 = vpop.xlane.xlu0 %292 }
  0xcf   :  { %v221_v53 = vpop.xlane.xlu1 %220  ;;  %v588_v63 = vsel %vm587_vm8, %v586_v11, %v581_v23  ;;  %v365_v8 = vsub.f32 0.0, %v293_v58  ;;  %v1588_v23 = vsub.s32 %v638_v19, %v1457_v15 }
  0xd0   :  { %v341_v54 = vsub.f32 0.0, %v221_v53  ;;  %v595_v27 = vsel %vm594_vm9, %v1508_v31, %v588_v63  ;;  %v1628_v63 = vsub.s32 %v659_v61, %v1457_v15 }
  0xd1   :  { %v762_v28 = vrot.slane %v365_v8, %v1478_v62 }
  0xd2   :  { %v1577_v14 = vrot.slane %v341_v54, %v1570_v46  ;;  %v251_v12 = vpop.xlane.xlu0 %250 }
  0xd3   :  { %v314_v22 = vpop.xlane.xlu1 %313  ;;  %v763_v38 = vsel %vm580_vm7, %v762_v28, %v758_v48  ;;  %v351_v51 = vsub.f32 0.0, %v251_v12  ;;  %vm824_vm7 = vcmask 1041409  }
  0xd4   :  { %v372_v36 = vsub.f32 0.0, %v314_v22  ;;  %v768_v57 = vsel %vm587_vm8, %v1512_v43, %v763_v38  ;;  %vm826_vm8 = vcmask 1042434  }
  0xd5   :  { %v693_v31 = vrot.slane %v351_v51, %v1502_v24 }
  0xd6   :  { %v1585_v55 = vrot.slane %v372_v36, %v1559_v42  ;;  %v206_v0 = vpop.xlane.xlu0 %205 }
  0xd7   :  { %v272_v62 = vpop.xlane.xlu1 %271  ;;  %v694_v4 = vsel %vm594_vm9, %v693_v31, %v689_v52  ;;  %v336_v5 = vsub.f32 0.0, %v206_v0 }
  0xd8   :  { %v358_v60 = vsub.f32 0.0, %v272_v62  ;;  %v699_v10 = vsel %vm601_vm10, %v1519_v1, %v694_v4 }
  0xd9   :  { %v600_v43 = vrot.slane %v336_v5, %v1515_v44 }
  0xda   :  { %v1596_v6 = vrot.slane %v358_v60, %v1588_v23  ;;  %v299_v21 = vpop.xlane.xlu0 %298 }
  0xdb   :  { %v227_v16 = vpop.xlane.xlu1 %226  ;;  %v602_v25 = vsel %vm601_vm10, %v600_v43, %v595_v27  ;;  %v367_v26 = vsub.f32 0.0, %v299_v21 }
  0xdc   :  { %v343_v18 = vsub.f32 0.0, %v227_v16  ;;  %v609_v33 = vsel %vm608_vm11, %v1527_v7, %v602_v25 }
  0xdd   :  { %v772_v47 = vrot.slane %v367_v26, %v1502_v24 }
  0xde   :  { %v1606_v29 = vrot.slane %v343_v18, %v1599_v9  ;;  %v257_v44 = vpop.xlane.xlu0 %256 }
  0xdf   :  { %v320_v1 = vpop.xlane.xlu1 %319  ;;  %v773_v20 = vsel %vm594_vm9, %v772_v47, %v768_v57  ;;  %v353_v49 = vsub.f32 0.0, %v257_v44 }
  0xe0   :  { %v374_v48 = vsub.f32 0.0, %v320_v1  ;;  %v778_v30 = vsel %vm601_vm10, %v1532_v37, %v773_v20 }
  0xe1   :  { %v703_v7 = vrot.slane %v353_v49, %v1522_v39 }
  0xe2   :  { %v1614_v35 = vrot.slane %v374_v48, %v1588_v23  ;;  %v212_v11 = vpop.xlane.xlu0 %211 }
  0xe3   :  { %v278_v24 = vpop.xlane.xlu1 %277  ;;  %v704_v53 = vsel %vm608_vm11, %v703_v7, %v699_v10  ;;  %v338_v54 = vsub.f32 0.0, %v212_v11 }
  0xe4   :  { %v360_v52 = vsub.f32 0.0, %v278_v24  ;;  %v709_v8 = vsel %vm615_vm12, %v1541_v2, %v704_v53 }
  0xe5   :  { %v614_v37 = vrot.slane %v338_v54, %v1535_v32 }
  0xe6   :  { %v1625_v58 = vrot.slane %v360_v52, %v1617_v50  ;;  %v305_v28 = vpop.xlane.xlu0 %304 }
  0xe7   :  { %v233_v19 = vpop.xlane.xlu1 %232  ;;  %v616_v22 = vsel %vm615_vm12, %v614_v37, %v609_v33  ;;  %v369_v36 = vsub.f32 0.0, %v305_v28 }
  0xe8   :  { %v345_v27 = vsub.f32 0.0, %v233_v19  ;;  %v623_v38 = vsel %vm622_vm13, %v1549_v17, %v616_v22 }
  0xe9   :  { %v782_v15 = vrot.slane %v369_v36, %v1522_v39 }
  0xea   :  { %v1635_v12 = vrot.slane %v345_v27, %v1628_v63  ;;  %v263_v2 = vpop.xlane.xlu0 %262 }
  0xeb   :  { %v326_v51 = vpop.xlane.xlu1 %325  ;;  %v783_v32 = vsel %vm608_vm11, %v782_v15, %v778_v30  ;;  %v355_v57 = vsub.f32 0.0, %v263_v2 }
  0xec   :  { %v376_v56 = vsub.f32 0.0, %v326_v51  ;;  %v788_v62 = vsel %vm615_vm12, %v1556_v41, %v783_v32 }
  0xed   :  { %v713_v60 = vrot.slane %v355_v57, %v1544_v3 }
  0xee   :  { %v817_v31 = vrot.slane %v376_v56, %v1617_v50  ;;  %v218_v4 = vpop.xlane.xlu0 %217 }
  0xef   :  { %v418_v0 = vpop.permute.xlu1 %417  ;;  %v714_v17 = vsel %vm622_vm13, %v713_v60, %v709_v8  ;;  %v340_v5 = vsub.f32 0.0, %v218_v4 }
  0xf0   :  { %vm460_vm15 = vcmp.eq.s32.totalorder %v418_v0, %v1441_v59  ;;  %v719_v39 = vsel %vm629_vm14, %v1567_v45, %v714_v17 }
  0xf1   :  { %v628_v10 = vrot.slane %v340_v5, %v1559_v42 }
  0xf2   :  { %v311_v41 = vpop.xlane.xlu0 %310 }
  0xf3   :  { %v421_v43 = vpop.permute.xlu1 %420  ;;  %v630_v16 = vsel %vm629_vm14, %v628_v10, %v623_v38  ;;  %v371_v18 = vsub.f32 0.0, %v311_v41  ;;  %v506_v10 = vld [vmem:[#allocation3] sm:$0x7] }
  0xf4   :  { %vm461_vm1 = vcmp.eq.s32.totalorder %v421_v43, %v1441_v59  ;;  %v637_v21 = vsel %vm636_vm0, %v1577_v14, %v630_v16 }
  0xf5   :  { %vm1016_vm2 = vmpackc.low %vm461_vm1, %vm460_vm15  ;;  %v792_v25 = vrot.slane %v371_v18, %v1544_v3 }
  0xf6   :  { %1017 = vmatpush3.bf16.msk.msra.mxu0 %vm1016_vm2, %v1070_v13  ;;  %v269_v45 = vpop.xlane.xlu0 %268 }
  0xf7   :  { %1018 = vmatprep.subr.bf16.mxu0 %v1069_v40  ;;  %v793_v42 = vsel %vm622_vm13, %v792_v25, %v788_v62  ;;  %v357_v26 = vsub.f32 0.0, %v269_v45  ;;  %v424_v54 = vpop.permute.xlu1 %423 }
  0xf8   :  { %v798_v34 = vsel %vm629_vm14, %v1585_v55, %v793_v42  ;;  %vm462_vm9 = vcmp.eq.s32.totalorder %v424_v54, %v1441_v59 }
  0xf9   :  { %v723_v33 = vrot.slane %v357_v26, %v1570_v46 }
  0xfa   :  { %v224_v47 = vpop.xlane.xlu0 %223 }
  0xfb   :  { %v724_v1 = vsel %vm636_vm0, %v723_v33, %v719_v39  ;;  %v342_v14 = vsub.f32 0.0, %v224_v47  ;;  %v430_v28 = vpop.permute.xlu1 %429 }
  0xfc   :  { %v729_v48 = vsel %vm643_vm3, %v1596_v6, %v724_v1  ;;  %vm464_vm12 = vcmp.eq.s32.totalorder %v430_v28, %v1441_v59 }
  0xfd   :  { %v642_v3 = vrot.slane %v342_v14, %v1588_v23 }
  0xfe   :  { %v317_v44 = vpop.xlane.xlu0 %316 }
  0xff   :  { %v644_v20 = vsel %vm643_vm3, %v642_v3, %v637_v21  ;;  %v373_v49 = vsub.f32 0.0, %v317_v44  ;;  %v436_v2 = vpop.permute.xlu1 %435 }
 0x100   :  { %v651_v61 = vsel %vm650_vm4, %v1606_v29, %v644_v20  ;;  %vm466_vm15 = vcmp.eq.s32.totalorder %v436_v2, %v1441_v59 }
 0x101   :  { %v802_v55 = vrot.slane %v373_v49, %v1570_v46 }
 0x102   :  { %v275_v30 = vpop.xlane.xlu0 %274 }
 0x103   :  { %v803_v7 = vsel %vm636_vm0, %v802_v55, %v798_v34  ;;  %v359_v24 = vsub.f32 0.0, %v275_v30  ;;  %v442_v62 = vpop.permute.xlu1 %441 }
 0x104   :  { %v808_v52 = vsel %vm643_vm3, %v1614_v35, %v803_v7  ;;  %vm468_vm2 = vcmp.eq.s32.totalorder %v442_v62, %v1441_v59 }
 0x105   :  { %v733_v11 = vrot.slane %v359_v24, %v1599_v9 }
 0x106   :  { %v230_v6 = vpop.xlane.xlu0 %229 }
 0x107   :  { %v734_v23 = vsel %vm650_vm4, %v733_v11, %v729_v48  ;;  %v344_v53 = vsub.f32 0.0, %v230_v6 }
 0x108   :  { %v739_v8 = vsel %vm657_vm5, %v1625_v58, %v734_v23 }
 0x109   :  { %v656_v29 = vrot.slane %v344_v53, %v1617_v50 }
 0x10a   :  { %v323_v46 = vpop.xlane.xlu0 %322 }
 0x10b   :  { %v658_v37 = vsel %vm657_vm5, %v656_v29, %v651_v61  ;;  %v375_v19 = vsub.f32 0.0, %v323_v46 }
 0x10c   :  { %v665_v35 = vsel %vm664_vm6, %v1635_v12, %v658_v37 }
 0x10d   :  { %v812_v27 = vrot.slane %v375_v19, %v1599_v9 }
 0x10e   :  { %v281_v22 = vpop.xlane.xlu0 %280 }
 0x10f   :  { %v813_v36 = vsel %vm650_vm4, %v812_v27, %v808_v52  ;;  %v361_v38 = vsub.f32 0.0, %v281_v22 }
 0x110   :  { %v818_v15 = vsel %vm657_vm5, %v817_v31, %v813_v36 }
 0x111   :  { %v743_v58 = vrot.slane %v361_v38, %v1628_v63 }
 0x112   :  { %v329_v50 = vpop.xlane.xlu0 %328 }
 0x113   :  { %v377_v51 = vsub.f32 0.0, %v329_v50  ;;  %v744_v56 = vsel %vm664_vm6, %v743_v58, %v739_v8 }
 0x114   :  { %v825_v32 = vsel %vm824_vm7, %v744_v56, %v665_v35 }
 0x115   :  { %v822_v12 = vrot.slane %v377_v51, %v1628_v63  ;;  %v448_v63 = vpop.permute.xlu1 %447 }
 0x116   :  { %vm470_vm5 = vcmp.eq.s32.totalorder %v448_v63, %v1441_v59 }
 0x117   :  { %v823_v9 = vsel %vm664_vm6, %v822_v12, %v818_v15 }
 0x118   :  { %v827_v57 = vsel %vm826_vm8, %v823_v9, %v825_v32 }
 0x119   :  { %v451_v4 = vpop.permute.xlu1 %450 }
 0x11a   :  { %v427_v60 = vpop.permute.xlu0 %426  ;;  %vm471_vm6 = vcmp.eq.s32.totalorder %v451_v4, %v1441_v59 }
 0x11b   :  { %vm463_vm10 = vcmp.eq.s32.totalorder %v427_v60, %v1441_v59  ;;  %vm1031_vm7 = vmpackc.low %vm471_vm6, %vm470_vm5 }
 0x11c   :  { %vm1019_vm11 = vmpackc.low %vm463_vm10, %vm462_vm9 }
 0x11d   :  { %1020 = vmatpush3.bf16.msk.msra.mxu0 %vm1019_vm11, %v1070_v13  ;;  %v457_v39 = vpop.permute.xlu1 %456 }
 0x11e   :  { %v433_v31 = vpop.permute.xlu0 %432  ;;  %1021 = vmatprep.subr.bf16.mxu0 %v1069_v40  ;;  %vm473_vm9 = vcmp.eq.s32.totalorder %v457_v39, %v1441_v59 }
 0x11f   :  { %vm465_vm13 = vcmp.eq.s32.totalorder %v433_v31, %v1441_v59 }
 0x120   :  { %vm1022_vm14 = vmpackc.low %vm465_vm13, %vm464_vm12 }
 0x121   :  { %1023 = vmatpush3.bf16.msk.msra.mxu0 %vm1022_vm14, %v1070_v13 }
 0x122   :  { %v439_v0 = vpop.permute.xlu0 %438  ;;  %1024 = vmatprep.subr.bf16.mxu0 %v1069_v40 }
 0x123   :  { %vm467_vm0 = vcmp.eq.s32.totalorder %v439_v0, %v1441_v59 }
 0x124   :  { %vm1025_vm1 = vmpackc.low %vm467_vm0, %vm466_vm15 }
 0x125   :  { %1026 = vmatpush3.bf16.msk.msra.mxu0 %vm1025_vm1, %v1070_v13 }
 0x126   :  { %v445_v17 = vpop.permute.xlu0 %444  ;;  %1027 = vmatprep.subr.bf16.mxu0 %v1069_v40 }
 0x127   :  { %vm469_vm3 = vcmp.eq.s32.totalorder %v445_v17, %v1441_v59 }
 0x128   :  { %vm1028_vm4 = vmpackc.low %vm469_vm3, %vm468_vm2 }
 0x129   :  { %1029 = vmatpush3.bf16.msk.msra.mxu0 %vm1028_vm4, %v1070_v13 }
 0x12a   :  { %v454_v5 = vpop.permute.xlu0 %453  ;;  %1030 = vmatprep.subr.bf16.mxu0 %v1069_v40 }
 0x12b   :  { %vm472_vm8 = vcmp.eq.s32.totalorder %v454_v5, %v1441_v59 }
 0x12c   :  { %vm1034_vm10 = vmpackc.low %vm473_vm9, %vm472_vm8 }
 0x12d   :  { %1032 = vmatpush3.bf16.msk.msra.mxu0 %vm1031_vm7, %v1070_v13 }
 0x12e   :  { %1033 = vmatprep.subr.bf16.mxu0 %v1069_v40 }
 0x131   :  { %1035 = vmatpush3.bf16.msk.msra.mxu0 %vm1034_vm10, %v1070_v13 }
 0x134   :  { %1010 = vmatmul.mubr.f32.vlgmr.msra.gmra.mrb[0].mxu0 %v827_v57 }
 0x207   :  { %v895_v43 = vpop.f32.mrb[0].mxu0 }
 0x208   :  { %v899_v41 = vadd.f32 %v895_v43, %v506_v10  ;;  %v1011_v16 = vpop.f32.mrb[1].mxu0 }
 0x20a   :  { %900 = vst [vmem:[#allocation3] sm:$0x7] %v899_v41 }
 0x20b   :  { %1055 = shalt.err (!%p1052_p4)
}
 0x20c   :  { %s1056_s4 = scalar_lea.hbm %s1722_s3, 64 }
 0x20d   :  { %p1057_p5 = scmp.ne.s32.totalorder %s1722_s3, %s1056_s4  ;;  %p1060_p6 = scmp.lt.u32.totalorder %s1056_s4, %s1722_s3 }
 0x20f   :  { %p1062_p7 = pnand %p1060_p6, %p1057_p5 }
 0x211   :  { %1065 = shalt.err (!%p1062_p7)
}
 0x212   :  { %910 = dma.vmem_to_hbm [thread:$0]  %s908_s28, 64, %s1722_s3, [#allocation4]  }
 0x213   :  { %1066 = dma.done.wait [#allocation4], 64  }
 0x214   :  { %1067 = vsyncadd [#allocation4], 4294967232 }
 0x215   :  { %914 = vsyncpa [#allocation4], 1 }

</bundles_post_ra>
